<compile_context>
chip_gen: v7x
topology: tpu7x:2x2x1
jax: 0.10.0
libtpu: 0.0.40
codegen_flags: <defaults>
</compile_context>

<pallas_src>
import jax
import jax.numpy as jnp
from jax.experimental import pallas as pl
from jax.experimental.pallas import tpu as pltpu


def _round_up(n, m):
    return ((n + m - 1) // m) * m


def _make_lambda_kernel(lmd, out_dtype):
    """Pallas kernel body applying `lmd` elementwise to the current tile."""
    def kernel(x_ref, o_ref):
        o_ref[...] = lmd(x_ref[...]).astype(out_dtype)
    return kernel


def lambda_module(x, lmd, *, block_bytes=4 * 1024 * 1024, lane=512,
                  small_bytes=256 * 1024):
    """Apply an elementwise lambda `lmd` to `x` via a Pallas streaming kernel.

    x           : jnp.ndarray (any shape, e.g. NCHW [B, C, H, W])
    lmd         : jnp-expressible elementwise function (the PyTorch lambda)
    block_bytes : target per-block VMEM footprint (~4 MiB)
    lane        : preferred lane-dense last-dim width (multiple of 128)
    small_bytes : below this size, skip Pallas and use a plain XLA fusion
    """
    orig_shape = x.shape
    in_dtype = x.dtype
    total = int(x.size)
    itemsize = jnp.dtype(in_dtype).itemsize

    # Output shape/dtype of the lambda without running it.
    out_aval = jax.eval_shape(lmd, jax.ShapeDtypeStruct(orig_shape, in_dtype))
    if out_aval.shape != tuple(orig_shape):
        # TODO(synk): shape-changing / non-elementwise lambda -> plain JAX.
        return lmd(x)
    out_dtype = out_aval.dtype
    out_itemsize = jnp.dtype(out_dtype).itemsize

    # Fast path: tiny tensors are cheaper as a pure-XLA fusion than pallas_call.
    if total == 0 or total * itemsize <= small_bytes:
        return lmd(x)

    # Lane-dense last dim; prefer a width dividing the element count so the
    # whole tensor streams through the kernel with zero wrapper-side copies.
    chosen_lane = lane
    for cand in (lane, 256, 128):
        if total % cand == 0:
            chosen_lane = cand
            break

    main_total = (total // chosen_lane) * chosen_lane
    rows = main_total // chosen_lane

    # Dtype-aware sublane packing: 8 rows for 4B, 16 for 2B, 32 for 1B dtypes.
    sublane_pack = max(8, 32 // itemsize, 32 // out_itemsize)

    # Rows per block: aim for ~block_bytes per block ...
    bytes_per_row = chosen_lane * max(itemsize, out_itemsize)
    target_rows = max(
        sublane_pack,
        (block_bytes // bytes_per_row) // sublane_pack * sublane_pack,
    )
    # ... but force >= 4 grid steps for inputs above ~1 MiB (megacore on v7x,
    # DMA/compute overlap on all generations).
    min_steps = 4 if total * itemsize > (1 << 20) else 1
    cap_rows = _round_up(pl.cdiv(rows, min_steps), sublane_pack)
    tr = max(sublane_pack, min(target_rows, cap_rows))
    # Never exceed available rows (post fast-path, rows >= sublane_pack).
    tr = min(tr, max(sublane_pack, (rows // sublane_pack) * sublane_pack))

    grid = (pl.cdiv(rows, tr),)

    # Flatten; the main slab reshape is zero-copy when chosen_lane divides total.
    x_flat = x.reshape(-1)
    if main_total != total:
        x_main = x_flat[:main_total].reshape(rows, chosen_lane)
    else:
        x_main = x_flat.reshape(rows, chosen_lane)

    kernel = _make_lambda_kernel(lmd, out_dtype)

    # Advisory cost for XLA scheduling, derived from the lambda itself so
    # transcendental-heavy lambdas (exp/tanh/...) are reported correctly.
    try:
        cost = pl.estimate_cost(
            lmd, jax.ShapeDtypeStruct((rows, chosen_lane), in_dtype))
    except Exception:
        cost = pl.CostEstimate(
            flops=2 * main_total,
            transcendentals=0,
            bytes_accessed=main_total * (itemsize + out_itemsize),
        )

    # VMEM budget: (in + out) blocks, double-buffered, plus headroom. Explicit
    # limit keeps 4 MiB blocks safe on v5e's 16 MiB scoped default and well
    # inside v7x's 64 MiB physical VMEM.
    block_vmem = tr * chosen_lane * (itemsize + out_itemsize)
    vmem_limit = min(48 * 1024 * 1024, 2 * block_vmem + (8 << 20))

    out2d = pl.pallas_call(
        kernel,
        out_shape=jax.ShapeDtypeStruct((rows, chosen_lane), out_dtype),
        grid_spec=pltpu.PrefetchScalarGridSpec(
            num_scalar_prefetch=0,
            grid=grid,
            in_specs=[pl.BlockSpec((tr, chosen_lane), lambda i: (i, 0))],
            out_specs=pl.BlockSpec((tr, chosen_lane), lambda i: (i, 0)),
        ),
        compiler_params=pltpu.CompilerParams(
            dimension_semantics=("parallel",),
            vmem_limit_bytes=vmem_limit),
        cost_estimate=cost,
    )(x_main)

    out_main = out2d.reshape(-1)
    if main_total != total:
        # Sub-lane tail (< chosen_lane elements): plain JAX, then stitch back.
        tail_out = lmd(x_flat[main_total:]).astype(out_dtype)
        out_flat = jnp.concatenate([out_main, tail_out])
    else:
        out_flat = out_main
    return out_flat.reshape(orig_shape)


if __name__ == "__main__":
    # The concrete lambda this Lambda module wraps (representative example).
    lmd = lambda x: x * 2.0 + 1.0

    key = jax.random.PRNGKey(0)

    # Case 1: small NCHW input (fast path, plain XLA).
    x1 = jax.random.normal(key, (2, 4, 16, 16), dtype=jnp.float32)
    # Case 2: small ragged input (fast path, plain XLA).
    x2 = jax.random.normal(jax.random.fold_in(key, 1), (3, 5, 7, 9),
                           dtype=jnp.float32)
    # Case 3: divisible input -> Pallas path, multi-step grid.
    x3 = jax.random.normal(jax.random.fold_in(key, 2), (8, 8, 128, 128),
                           dtype=jnp.float32)
    # Case 4: ragged (not divisible by 128) -> Pallas main slab + JAX tail.
    x4 = jax.random.normal(jax.random.fold_in(key, 3), (3, 5, 67, 129),
                           dtype=jnp.float32)

    for x in (x1, x2, x3, x4):
        out = jax.block_until_ready(lambda_module(x, lmd))
        ref = lmd(x)
        assert out.shape == x.shape, (out.shape, x.shape)
        assert out.dtype == ref.dtype, (out.dtype, ref.dtype)
        assert jnp.allclose(out, ref, atol=1e-6, rtol=1e-6)

    print("KERNEL_OK")
</pallas_src>

<mosaic_0001>
module attributes {stable_mosaic.version = 11 : i64} {
  func.func @kernel(%arg0: i32, %arg1: memref<512x512xf32, #tpu.memory_space<vmem>>, %arg2: memref<512x512xf32, #tpu.memory_space<vmem>>) attributes {dimension_semantics = [#tpu.dimension_semantics<parallel>], iteration_bounds = array<i64: 4>, scalar_prefetch = 0 : i64, scratch_operands = 0 : i64, tpu.core_type = #tpu.core_type<tc>, window_params = [{transform_indices = @transform_0, window_bounds = array<i64: 512, 512>}, {transform_indices = @transform_1, window_bounds = array<i64: 512, 512>}]} {
    %c0 = arith.constant 0 : index
    %c0_0 = arith.constant 0 : index
    %0 = vector.load %arg1[%c0, %c0_0] : memref<512x512xf32, #tpu.memory_space<vmem>>, vector<512x512xf32>
    %cst = arith.constant 2.000000e+00 : f32
    %1 = vector.broadcast %cst : f32 to vector<512x512xf32>
    %2 = arith.mulf %0, %1 : vector<512x512xf32>
    %cst_1 = arith.constant 1.000000e+00 : f32
    %3 = vector.broadcast %cst_1 : f32 to vector<512x512xf32>
    %4 = arith.addf %2, %3 : vector<512x512xf32>
    %c0_2 = arith.constant 0 : index
    %c0_3 = arith.constant 0 : index
    %5 = vector.load %arg2[%c0_2, %c0_3] : memref<512x512xf32, #tpu.memory_space<vmem>>, vector<512x512xf32>
    tpu.vector_store %arg2[%c0_2, %c0_3], %4 {strides = array<i32>} : memref<512x512xf32, #tpu.memory_space<vmem>>, vector<512x512xf32>,
    return
  }
  func.func @transform_0(%arg0: i32) -> (i32, i32) {
    %c0_i32 = arith.constant 0 : i32
    %c0_i32_0 = arith.constant 0 : i32
    return %arg0, %c0_i32 : i32, i32
  }
  func.func @transform_1(%arg0: i32) -> (i32, i32) {
    %c0_i32 = arith.constant 0 : i32
    %c0_i32_0 = arith.constant 0 : i32
    return %arg0, %c0_i32 : i32, i32
  }
}

</mosaic_0001>

<bundles_post_ra>
// kernel: tpu_custom_call.1
= control target key start
LH: loop header
LB: loop body
LE: loop exit
PB: predicated region body
PF: predicated region fallthrough
CT: control target
= control target key end

     0   :  { %6 = vsyncpa [#allocation3], 0  ;;  %s2115_s0 = inlined_call_operand.hbm [shape: f32[2048,512], index: 0, kind: input, shape index: {}]   ;;  %s2116_s1 = inlined_call_operand.hbm [shape: f32[2048,512], index: 1, kind: output, shape index: {}]  }
   0x1   :  { %8 = vsyncpa [#allocation3 + $0x1], 0 }
   0x2   :  { %9 = vsyncpa [#allocation4], 0 }
   0x3   :  { %11 = vsyncpa [#allocation4 + $0x1], 0  ;;  %s1434_s6 = smov 0   ;;  %s1436_s7 = smov 0  }
   0x4   :  { %s1438_s8 = smov 0   ;;  %s1440_s9 = smov 0  }
   0x5 LB: > { %s1455_s10 = sadd.s32 4294967295, %s1416_s9   ;;  %s1250_s11 = sadd.s32 4294967294, %s1416_s9   ;;  %s1416_s9 = sphi %s1440_s9, %s2128_s9   ;;  %s1412_s8 = sphi %s1438_s8, %s2127_s8   ;;  %s1408_s7 = sphi %s1436_s7, %s2126_s7   ;;  %s1404_s6 = sphi %s1434_s6, %s2125_s6  }
   0x6   : > { %s1459_s12 = sadd.s32 1, %s1416_s9   ;;  %s24_s13 = sadd.s32 1, %s1412_s8 }
   0x7   : > { %s21_s14 = ssub.s32 %s1416_s9, %s1459_s12  ;;  %p31_p0 = scmp.ne.s32.totalorder %s1412_s8, %s1408_s7 }
   0x8   : > { %p22_p1 = scmp.eq.s32.totalorder %s21_s14, 0  ;;  %p32_p2 = scmp.eq.s32.totalorder %s1416_s9, 0 }
   0x9   : > { %p37_p3 = scmp.ne.s32.totalorder %s1408_s7, %s1404_s6  ;;  %p38_p4 = scmp.eq.s32.totalorder %s1455_s10, 0 }
   0xa   : > { %s1471_s15 = scalar_select %p22_p1, %s1412_s8, %s24_s13  }
   0xb   : > { %p1473_p5 = por %p32_p2, %p31_p0  ;;  %p1477_p6 = por %p38_p4, %p37_p3 }
   0xc   : > { %p61_p7 = scmp.eq.s32.totalorder %s1455_s10, 3  ;;  %p67_p8 = scmp.eq.s32.totalorder %s1250_s11, 3 }
   0xd   : > { %p1282_p9 = scmp.lt.s32.totalorder %s1416_s9, 4  ;;  %s87_s20 = sand.u32 1, %s1412_s8  }
   0xe   : > { %p1483_p10 = por %p61_p7, %p31_p0  ;;  %p1487_p11 = por %p67_p8, %p37_p3 }
   0xf   : > { %s1267_s21 = sshll.u32 %s1416_s9, 15  ;;  %s1253_s22 = sshll.u32 %s87_s20, 11 }
  0x10   : > { %s2120_s18 = scalar_select %p1483_p10, 1, 0 }
  0x11   : > { %s2121_s19 = scalar_select %p1487_p11, 1, 0 }
  0x12   : > { %s1496_s25 = scalar_lea.hbm %s2115_s0, %s1267_s21  ;;  %s91_s26 = scalar_lea.vmem [#allocation2], %s1253_s22 }
  0x13   : > { %s99_s27 = sshll.u32 %s91_s26, 4  ;;  %p1500_p12 = pnand %p1282_p9, %p1473_p5  ;;  %s1504_s27 = int_to_ptr.vmem [resolvable:$true] %s99_s27 }
  0x14   : > { %s1506_s29 = scalar_lea.sflag [#allocation3], %s87_s20  ;;  %s1320_s30 = scalar_lea.hbm %s1496_s25, 32768 }
  0x15   : > { %p1321_p13 = scmp.ne.s32.totalorder %s1496_s25, %s1320_s30  ;;  %p1322_p0 = pneg %p1500_p12 }
  0x16   : > { %s1325_s4 = scalar_lea.hbm %s2115_s0, 131072  ;;  %p1326_p3 = scmp.lt.u32.totalorder %s1496_s25, %s2115_s0 }
  0x17   : > { %p1323_p1 = pnand %p1322_p0, %p1321_p13  ;;  %p1327_p4 = scmp.lt.u32.totalorder %s1325_s4, %s1320_s30 }
  0x18   : > { %p1329_p7 = scmp.lt.u32.totalorder %s1320_s30, %s1496_s25 }
  0x19   : > { %p1324_p2 = pneg %p1323_p1  ;;  %p1328_p5 = por %p1327_p4, %p1326_p3 }
  0x1b   : > { %p1330_p8 = por %p1329_p7, %p1328_p5 }
  0x1d   : > { %p1331_p9 = pnand %p1330_p8, %p1324_p2 }
  0x1f   : > { %1334 = shalt.err (!%p1331_p9)
}
  0x20   : > { %s1335_s13 = scalar_lea.vmem %s1504_s27, 32768  ;;  %s1418_s14 = smov [#allocation2]  }
  0x21   : > { %p1336_p13 = scmp.ne.s32.totalorder %s1504_s27, %s1335_s13  ;;  %s1340_s16 = sshll.u32 %s1418_s14, 4  ;;  %s1341_s16 = int_to_ptr.vmem [resolvable:$false] %s1340_s16 }
  0x22   : > { %s1342_s20 = scalar_lea.vmem %s1341_s16, 65536  ;;  %p1343_p10 = scmp.lt.s32.totalorder %s1504_s27, %s1341_s16 }
  0x23   : > { %p1338_p1 = pnand %p1336_p13, %p1322_p0  ;;  %p1344_p3 = scmp.lt.s32.totalorder %s1342_s20, %s1335_s13 }
  0x25   : > { %p1339_p11 = pneg %p1338_p1  ;;  %p1345_p4 = por %p1344_p3, %p1343_p10 }
  0x27   : > { %p1346_p5 = pnand %p1345_p4, %p1339_p11 }
  0x29   : > { %1349 = shalt.err (!%p1346_p5)
}
  0x2a   : > { %s1419_s21 = smov 512   ;;  %s1420_s22 = smov 32  }
  0x2b   : > { %1277 = dma.hbm_to_vmem [thread:$0]  (!%p1500_p12), %s1496_s25, 32768, %s1504_s27, %s1506_s29, %s1419_s21, %s1419_s21, %s1420_s22  }
  0x2c   : > { %p1257_p0 = scmp.ge.s32.totalorder %s1416_s9, 1  ;;  %p107_p2 = scmp.lt.s32.totalorder %s1416_s9, 5 }
  0x2e   : > { %p108_p7 = pnand %p1257_p0, %p107_p2 }
  0x2f   : > { %s1537_s23 = sand.u32 (!%p108_p7), 1, %s1408_s7  }
  0x30   : > { %111 = sbr.rel (%p108_p7) target bundleno = 250 (0xfa), region = 24  ;;  %s1258_s24 = sshll.u32 (!%p108_p7), %s1537_s23, 11 }
  0x31   : > { %s114_s26 = scalar_lea.sflag (!%p108_p7), [#allocation3], %s1537_s23  ;;  %s1543_s30 = scalar_lea.vmem (!%p108_p7), [#allocation2], %s1258_s24 }
  0x37   : > { %1395 = dma.done.wait (%p1477_p6), %s114_s26, 32768  }
  0x38   : > { %1397 = vsyncadd (%p1477_p6), %s114_s26, 4294934528  ;;  %v138_v0 = vld [vmem:[%s1543_s30] sm:$0xff]  ;;  %v139_v1 = vld [vmem:[%s1543_s30 + $0x8] sm:$0xff]  ;;  %s1564_s17 = scalar_lea.vmem [#allocation5], %s1258_s24  ;;  %s1269_s25 = sshll.u32 %s1455_s10, 15 }
  0x39   : > { %v140_v2 = vld [vmem:[%s1543_s30 + $0x10] sm:$0xff]  ;;  %v394_v3 = vmul.f32 2.0, %v138_v0  ;;  %v395_v4 = vmul.f32 2.0, %v139_v1  ;;  %v141_v6 = vld [vmem:[%s1543_s30 + $0x18] sm:$0xff]  ;;  %v142_v7 = vld [vmem:[%s1543_s30 + $0x20] sm:$0xff]  ;;  %s1177_s27 = sshll.u32 %s1564_s17, 4  ;;  %s2065_s2 = scalar_lea.hbm %s2116_s1, %s1269_s25  ;;  %s2067_s27 = int_to_ptr.vmem [resolvable:$true] %s1177_s27 }
  0x3a   : > { %v396_v5 = vmul.f32 2.0, %v140_v2  ;;  %v143_v8 = vld [vmem:[%s1543_s30 + $0x28] sm:$0xff]  ;;  %v397_v9 = vmul.f32 2.0, %v141_v6  ;;  %v398_v10 = vmul.f32 2.0, %v142_v7  ;;  %v144_v12 = vld [vmem:[%s1543_s30 + $0x30] sm:$0xff]  ;;  %v145_v13 = vld [vmem:[%s1543_s30 + $0x38] sm:$0xff] }
  0x3b   : > { %v399_v11 = vmul.f32 2.0, %v143_v8  ;;  %v146_v14 = vld [vmem:[%s1543_s30 + $0x40] sm:$0xff]  ;;  %v650_v15 = vadd.f32 1.0, %v394_v3  ;;  %v651_v16 = vadd.f32 1.0, %v395_v4  ;;  %v400_v18 = vmul.f32 2.0, %v144_v12  ;;  %v147_v19 = vld [vmem:[%s1543_s30 + $0x48] sm:$0xff] }
  0x3c   : > { %v652_v17 = vadd.f32 1.0, %v396_v5  ;;  %v148_v20 = vld [vmem:[%s1543_s30 + $0x50] sm:$0xff]  ;;  %v653_v21 = vadd.f32 1.0, %v397_v9  ;;  %v654_v22 = vadd.f32 1.0, %v398_v10  ;;  %v401_v24 = vmul.f32 2.0, %v145_v13  ;;  %v149_v25 = vld [vmem:[%s1543_s30 + $0x58] sm:$0xff] }
  0x3d   : > { %v655_v23 = vadd.f32 1.0, %v399_v11  ;;  %v150_v26 = vld [vmem:[%s1543_s30 + $0x60] sm:$0xff]  ;;  %906 = vst [vmem:[%s1564_s17] sm:$0xff] %v650_v15  ;;  %907 = vst [vmem:[%s1564_s17 + $0x8] sm:$0xff] %v651_v16  ;;  %v656_v27 = vadd.f32 1.0, %v400_v18  ;;  %v402_v28 = vmul.f32 2.0, %v146_v14  ;;  %v403_v29 = vmul.f32 2.0, %v147_v19 }
  0x3e   : > { %908 = vst [vmem:[%s1564_s17 + $0x10] sm:$0xff] %v652_v17  ;;  %v404_v30 = vmul.f32 2.0, %v148_v20  ;;  %v151_v31 = vld [vmem:[%s1543_s30 + $0x68] sm:$0xff]  ;;  %v152_v32 = vld [vmem:[%s1543_s30 + $0x70] sm:$0xff]  ;;  %909 = vst [vmem:[%s1564_s17 + $0x18] sm:$0xff] %v653_v21  ;;  %v657_v33 = vadd.f32 1.0, %v401_v24 }
  0x3f   : > { %910 = vst [vmem:[%s1564_s17 + $0x20] sm:$0xff] %v654_v22  ;;  %911 = vst [vmem:[%s1564_s17 + $0x28] sm:$0xff] %v655_v23  ;;  %v405_v34 = vmul.f32 2.0, %v149_v25  ;;  %v406_v35 = vmul.f32 2.0, %v150_v26  ;;  %v407_v36 = vmul.f32 2.0, %v151_v31  ;;  %v153_v37 = vld [vmem:[%s1543_s30 + $0x78] sm:$0xff] }
  0x40   : > { %v154_v38 = vld [vmem:[%s1543_s30 + $0x80] sm:$0xff]  ;;  %912 = vst [vmem:[%s1564_s17 + $0x30] sm:$0xff] %v656_v27  ;;  %v658_v39 = vadd.f32 1.0, %v402_v28  ;;  %v659_v40 = vadd.f32 1.0, %v403_v29  ;;  %v660_v41 = vadd.f32 1.0, %v404_v30  ;;  %v408_v42 = vmul.f32 2.0, %v152_v32 }
  0x41   : > { %v155_v43 = vld [vmem:[%s1543_s30 + $0x88] sm:$0xff]  ;;  %v156_v44 = vld [vmem:[%s1543_s30 + $0x90] sm:$0xff]  ;;  %913 = vst [vmem:[%s1564_s17 + $0x38] sm:$0xff] %v657_v33  ;;  %v661_v45 = vadd.f32 1.0, %v405_v34  ;;  %v662_v46 = vadd.f32 1.0, %v406_v35  ;;  %v663_v47 = vadd.f32 1.0, %v407_v36 }
  0x42   : > { %v409_v48 = vmul.f32 2.0, %v153_v37  ;;  %v157_v49 = vld [vmem:[%s1543_s30 + $0x98] sm:$0xff]  ;;  %v158_v50 = vld [vmem:[%s1543_s30 + $0xa0] sm:$0xff]  ;;  %914 = vst [vmem:[%s1564_s17 + $0x40] sm:$0xff] %v658_v39  ;;  %915 = vst [vmem:[%s1564_s17 + $0x48] sm:$0xff] %v659_v40  ;;  %v664_v51 = vadd.f32 1.0, %v408_v42 }
  0x43   : > { %916 = vst [vmem:[%s1564_s17 + $0x50] sm:$0xff] %v660_v41  ;;  %v410_v52 = vmul.f32 2.0, %v154_v38  ;;  %v411_v53 = vmul.f32 2.0, %v155_v43  ;;  %v412_v54 = vmul.f32 2.0, %v156_v44  ;;  %v159_v55 = vld [vmem:[%s1543_s30 + $0xa8] sm:$0xff]  ;;  %v160_v56 = vld [vmem:[%s1543_s30 + $0xb0] sm:$0xff] }
  0x44   : > { %917 = vst [vmem:[%s1564_s17 + $0x58] sm:$0xff] %v661_v45  ;;  %918 = vst [vmem:[%s1564_s17 + $0x60] sm:$0xff] %v662_v46  ;;  %v665_v57 = vadd.f32 1.0, %v409_v48  ;;  %v413_v58 = vmul.f32 2.0, %v157_v49  ;;  %v414_v59 = vmul.f32 2.0, %v158_v50  ;;  %v415_v60 = vmul.f32 2.0, %v159_v55 }
  0x45   : > { %919 = vst [vmem:[%s1564_s17 + $0x68] sm:$0xff] %v663_v47  ;;  %v161_v61 = vld [vmem:[%s1543_s30 + $0xb8] sm:$0xff]  ;;  %v162_v62 = vld [vmem:[%s1543_s30 + $0xc0] sm:$0xff]  ;;  %920 = vst [vmem:[%s1564_s17 + $0x70] sm:$0xff] %v664_v51  ;;  %v666_v63 = vadd.f32 1.0, %v410_v52  ;;  %v667_v0 = vadd.f32 1.0, %v411_v53 }
  0x46   : > { %v668_v1 = vadd.f32 1.0, %v412_v54  ;;  %v416_v2 = vmul.f32 2.0, %v160_v56  ;;  %v163_v3 = vld [vmem:[%s1543_s30 + $0xc8] sm:$0xff]  ;;  %v164_v4 = vld [vmem:[%s1543_s30 + $0xd0] sm:$0xff]  ;;  %921 = vst [vmem:[%s1564_s17 + $0x78] sm:$0xff] %v665_v57  ;;  %v669_v5 = vadd.f32 1.0, %v413_v58 }
  0x47   : > { %v670_v6 = vadd.f32 1.0, %v414_v59  ;;  %v671_v7 = vadd.f32 1.0, %v415_v60  ;;  %v417_v8 = vmul.f32 2.0, %v161_v61  ;;  %v165_v9 = vld [vmem:[%s1543_s30 + $0xd8] sm:$0xff]  ;;  %v166_v10 = vld [vmem:[%s1543_s30 + $0xe0] sm:$0xff]  ;;  %922 = vst [vmem:[%s1564_s17 + $0x80] sm:$0xff] %v666_v63 }
  0x48   : > { %923 = vst [vmem:[%s1564_s17 + $0x88] sm:$0xff] %v667_v0  ;;  %924 = vst [vmem:[%s1564_s17 + $0x90] sm:$0xff] %v668_v1  ;;  %v672_v11 = vadd.f32 1.0, %v416_v2  ;;  %v418_v12 = vmul.f32 2.0, %v162_v62  ;;  %v419_v13 = vmul.f32 2.0, %v163_v3  ;;  %v420_v14 = vmul.f32 2.0, %v164_v4 }
  0x49   : > { %v167_v15 = vld [vmem:[%s1543_s30 + $0xe8] sm:$0xff]  ;;  %v168_v16 = vld [vmem:[%s1543_s30 + $0xf0] sm:$0xff]  ;;  %925 = vst [vmem:[%s1564_s17 + $0x98] sm:$0xff] %v669_v5  ;;  %926 = vst [vmem:[%s1564_s17 + $0xa0] sm:$0xff] %v670_v6  ;;  %v673_v17 = vadd.f32 1.0, %v417_v8  ;;  %v421_v18 = vmul.f32 2.0, %v165_v9 }
  0x4a   : > { %927 = vst [vmem:[%s1564_s17 + $0xa8] sm:$0xff] %v671_v7  ;;  %v422_v19 = vmul.f32 2.0, %v166_v10  ;;  %v423_v20 = vmul.f32 2.0, %v167_v15  ;;  %v169_v21 = vld [vmem:[%s1543_s30 + $0xf8] sm:$0xff]  ;;  %v170_v22 = vld [vmem:[%s1543_s30 + $0x100] sm:$0xff]  ;;  %928 = vst [vmem:[%s1564_s17 + $0xb0] sm:$0xff] %v672_v11 }
  0x4b   : > { %v674_v23 = vadd.f32 1.0, %v418_v12  ;;  %v675_v24 = vadd.f32 1.0, %v419_v13  ;;  %v676_v25 = vadd.f32 1.0, %v420_v14  ;;  %v424_v26 = vmul.f32 2.0, %v168_v16  ;;  %v171_v27 = vld [vmem:[%s1543_s30 + $0x108] sm:$0xff]  ;;  %v172_v28 = vld [vmem:[%s1543_s30 + $0x110] sm:$0xff] }
  0x4c   : > { %929 = vst [vmem:[%s1564_s17 + $0xb8] sm:$0xff] %v673_v17  ;;  %v677_v29 = vadd.f32 1.0, %v421_v18  ;;  %v678_v30 = vadd.f32 1.0, %v422_v19  ;;  %v679_v31 = vadd.f32 1.0, %v423_v20  ;;  %v425_v32 = vmul.f32 2.0, %v169_v21  ;;  %v173_v33 = vld [vmem:[%s1543_s30 + $0x118] sm:$0xff] }
  0x4d   : > { %v174_v34 = vld [vmem:[%s1543_s30 + $0x120] sm:$0xff]  ;;  %930 = vst [vmem:[%s1564_s17 + $0xc0] sm:$0xff] %v674_v23  ;;  %931 = vst [vmem:[%s1564_s17 + $0xc8] sm:$0xff] %v675_v24  ;;  %v680_v35 = vadd.f32 1.0, %v424_v26  ;;  %v426_v36 = vmul.f32 2.0, %v170_v22  ;;  %v427_v37 = vmul.f32 2.0, %v171_v27 }
  0x4e   : > { %932 = vst [vmem:[%s1564_s17 + $0xd0] sm:$0xff] %v676_v25  ;;  %v428_v38 = vmul.f32 2.0, %v172_v28  ;;  %v175_v39 = vld [vmem:[%s1543_s30 + $0x128] sm:$0xff]  ;;  %v176_v40 = vld [vmem:[%s1543_s30 + $0x130] sm:$0xff]  ;;  %933 = vst [vmem:[%s1564_s17 + $0xd8] sm:$0xff] %v677_v29  ;;  %v681_v41 = vadd.f32 1.0, %v425_v32 }
  0x4f   : > { %934 = vst [vmem:[%s1564_s17 + $0xe0] sm:$0xff] %v678_v30  ;;  %935 = vst [vmem:[%s1564_s17 + $0xe8] sm:$0xff] %v679_v31  ;;  %v429_v42 = vmul.f32 2.0, %v173_v33  ;;  %v430_v43 = vmul.f32 2.0, %v174_v34  ;;  %v431_v44 = vmul.f32 2.0, %v175_v39  ;;  %v177_v45 = vld [vmem:[%s1543_s30 + $0x138] sm:$0xff] }
  0x50   : > { %v178_v46 = vld [vmem:[%s1543_s30 + $0x140] sm:$0xff]  ;;  %936 = vst [vmem:[%s1564_s17 + $0xf0] sm:$0xff] %v680_v35  ;;  %v682_v47 = vadd.f32 1.0, %v426_v36  ;;  %v683_v48 = vadd.f32 1.0, %v427_v37  ;;  %v684_v49 = vadd.f32 1.0, %v428_v38  ;;  %v432_v50 = vmul.f32 2.0, %v176_v40 }
  0x51   : > { %v179_v51 = vld [vmem:[%s1543_s30 + $0x148] sm:$0xff]  ;;  %v180_v52 = vld [vmem:[%s1543_s30 + $0x150] sm:$0xff]  ;;  %937 = vst [vmem:[%s1564_s17 + $0xf8] sm:$0xff] %v681_v41  ;;  %v685_v53 = vadd.f32 1.0, %v429_v42  ;;  %v686_v54 = vadd.f32 1.0, %v430_v43  ;;  %v687_v55 = vadd.f32 1.0, %v431_v44 }
  0x52   : > { %v433_v56 = vmul.f32 2.0, %v177_v45  ;;  %v181_v57 = vld [vmem:[%s1543_s30 + $0x158] sm:$0xff]  ;;  %v182_v58 = vld [vmem:[%s1543_s30 + $0x160] sm:$0xff]  ;;  %938 = vst [vmem:[%s1564_s17 + $0x100] sm:$0xff] %v682_v47  ;;  %939 = vst [vmem:[%s1564_s17 + $0x108] sm:$0xff] %v683_v48  ;;  %v688_v59 = vadd.f32 1.0, %v432_v50 }
  0x53   : > { %940 = vst [vmem:[%s1564_s17 + $0x110] sm:$0xff] %v684_v49  ;;  %v434_v60 = vmul.f32 2.0, %v178_v46  ;;  %v435_v61 = vmul.f32 2.0, %v179_v51  ;;  %v436_v62 = vmul.f32 2.0, %v180_v52  ;;  %v183_v63 = vld [vmem:[%s1543_s30 + $0x168] sm:$0xff]  ;;  %v184_v0 = vld [vmem:[%s1543_s30 + $0x170] sm:$0xff] }
  0x54   : > { %941 = vst [vmem:[%s1564_s17 + $0x118] sm:$0xff] %v685_v53  ;;  %942 = vst [vmem:[%s1564_s17 + $0x120] sm:$0xff] %v686_v54  ;;  %v689_v1 = vadd.f32 1.0, %v433_v56  ;;  %v437_v2 = vmul.f32 2.0, %v181_v57  ;;  %v438_v3 = vmul.f32 2.0, %v182_v58  ;;  %v439_v4 = vmul.f32 2.0, %v183_v63 }
  0x55   : > { %943 = vst [vmem:[%s1564_s17 + $0x128] sm:$0xff] %v687_v55  ;;  %v185_v5 = vld [vmem:[%s1543_s30 + $0x178] sm:$0xff]  ;;  %v186_v6 = vld [vmem:[%s1543_s30 + $0x180] sm:$0xff]  ;;  %944 = vst [vmem:[%s1564_s17 + $0x130] sm:$0xff] %v688_v59  ;;  %v690_v7 = vadd.f32 1.0, %v434_v60  ;;  %v691_v8 = vadd.f32 1.0, %v435_v61 }
  0x56   : > { %v692_v9 = vadd.f32 1.0, %v436_v62  ;;  %v440_v10 = vmul.f32 2.0, %v184_v0  ;;  %v187_v11 = vld [vmem:[%s1543_s30 + $0x188] sm:$0xff]  ;;  %v188_v12 = vld [vmem:[%s1543_s30 + $0x190] sm:$0xff]  ;;  %945 = vst [vmem:[%s1564_s17 + $0x138] sm:$0xff] %v689_v1  ;;  %v693_v13 = vadd.f32 1.0, %v437_v2 }
  0x57   : > { %v694_v14 = vadd.f32 1.0, %v438_v3  ;;  %v695_v15 = vadd.f32 1.0, %v439_v4  ;;  %v441_v16 = vmul.f32 2.0, %v185_v5  ;;  %v189_v17 = vld [vmem:[%s1543_s30 + $0x198] sm:$0xff]  ;;  %v190_v18 = vld [vmem:[%s1543_s30 + $0x1a0] sm:$0xff]  ;;  %946 = vst [vmem:[%s1564_s17 + $0x140] sm:$0xff] %v690_v7 }
  0x58   : > { %947 = vst [vmem:[%s1564_s17 + $0x148] sm:$0xff] %v691_v8  ;;  %948 = vst [vmem:[%s1564_s17 + $0x150] sm:$0xff] %v692_v9  ;;  %v696_v19 = vadd.f32 1.0, %v440_v10  ;;  %v442_v20 = vmul.f32 2.0, %v186_v6  ;;  %v443_v21 = vmul.f32 2.0, %v187_v11  ;;  %v444_v22 = vmul.f32 2.0, %v188_v12 }
  0x59   : > { %v191_v23 = vld [vmem:[%s1543_s30 + $0x1a8] sm:$0xff]  ;;  %v192_v24 = vld [vmem:[%s1543_s30 + $0x1b0] sm:$0xff]  ;;  %949 = vst [vmem:[%s1564_s17 + $0x158] sm:$0xff] %v693_v13  ;;  %950 = vst [vmem:[%s1564_s17 + $0x160] sm:$0xff] %v694_v14  ;;  %v697_v25 = vadd.f32 1.0, %v441_v16  ;;  %v445_v26 = vmul.f32 2.0, %v189_v17 }
  0x5a   : > { %951 = vst [vmem:[%s1564_s17 + $0x168] sm:$0xff] %v695_v15  ;;  %v446_v27 = vmul.f32 2.0, %v190_v18  ;;  %v447_v28 = vmul.f32 2.0, %v191_v23  ;;  %v193_v29 = vld [vmem:[%s1543_s30 + $0x1b8] sm:$0xff]  ;;  %v194_v30 = vld [vmem:[%s1543_s30 + $0x1c0] sm:$0xff]  ;;  %952 = vst [vmem:[%s1564_s17 + $0x170] sm:$0xff] %v696_v19 }
  0x5b   : > { %v698_v31 = vadd.f32 1.0, %v442_v20  ;;  %v699_v32 = vadd.f32 1.0, %v443_v21  ;;  %v700_v33 = vadd.f32 1.0, %v444_v22  ;;  %v448_v34 = vmul.f32 2.0, %v192_v24  ;;  %v195_v35 = vld [vmem:[%s1543_s30 + $0x1c8] sm:$0xff]  ;;  %v196_v36 = vld [vmem:[%s1543_s30 + $0x1d0] sm:$0xff] }
  0x5c   : > { %953 = vst [vmem:[%s1564_s17 + $0x178] sm:$0xff] %v697_v25  ;;  %v701_v37 = vadd.f32 1.0, %v445_v26  ;;  %v702_v38 = vadd.f32 1.0, %v446_v27  ;;  %v703_v39 = vadd.f32 1.0, %v447_v28  ;;  %v449_v40 = vmul.f32 2.0, %v193_v29  ;;  %v197_v41 = vld [vmem:[%s1543_s30 + $0x1d8] sm:$0xff] }
  0x5d   : > { %v198_v42 = vld [vmem:[%s1543_s30 + $0x1e0] sm:$0xff]  ;;  %954 = vst [vmem:[%s1564_s17 + $0x180] sm:$0xff] %v698_v31  ;;  %955 = vst [vmem:[%s1564_s17 + $0x188] sm:$0xff] %v699_v32  ;;  %v704_v43 = vadd.f32 1.0, %v448_v34  ;;  %v450_v44 = vmul.f32 2.0, %v194_v30  ;;  %v451_v45 = vmul.f32 2.0, %v195_v35 }
  0x5e   : > { %956 = vst [vmem:[%s1564_s17 + $0x190] sm:$0xff] %v700_v33  ;;  %v452_v46 = vmul.f32 2.0, %v196_v36  ;;  %v199_v47 = vld [vmem:[%s1543_s30 + $0x1e8] sm:$0xff]  ;;  %v200_v48 = vld [vmem:[%s1543_s30 + $0x1f0] sm:$0xff]  ;;  %957 = vst [vmem:[%s1564_s17 + $0x198] sm:$0xff] %v701_v37  ;;  %v705_v49 = vadd.f32 1.0, %v449_v40 }
  0x5f   : > { %958 = vst [vmem:[%s1564_s17 + $0x1a0] sm:$0xff] %v702_v38  ;;  %959 = vst [vmem:[%s1564_s17 + $0x1a8] sm:$0xff] %v703_v39  ;;  %v453_v50 = vmul.f32 2.0, %v197_v41  ;;  %v454_v51 = vmul.f32 2.0, %v198_v42  ;;  %v455_v52 = vmul.f32 2.0, %v199_v47  ;;  %v201_v53 = vld [vmem:[%s1543_s30 + $0x1f8] sm:$0xff] }
  0x60   : > { %v202_v54 = vld [vmem:[%s1543_s30 + $0x200] sm:$0xff]  ;;  %960 = vst [vmem:[%s1564_s17 + $0x1b0] sm:$0xff] %v704_v43  ;;  %v706_v55 = vadd.f32 1.0, %v450_v44  ;;  %v707_v56 = vadd.f32 1.0, %v451_v45  ;;  %v708_v57 = vadd.f32 1.0, %v452_v46  ;;  %v456_v58 = vmul.f32 2.0, %v200_v48 }
  0x61   : > { %v203_v59 = vld [vmem:[%s1543_s30 + $0x208] sm:$0xff]  ;;  %v204_v60 = vld [vmem:[%s1543_s30 + $0x210] sm:$0xff]  ;;  %961 = vst [vmem:[%s1564_s17 + $0x1b8] sm:$0xff] %v705_v49  ;;  %v709_v61 = vadd.f32 1.0, %v453_v50  ;;  %v710_v62 = vadd.f32 1.0, %v454_v51  ;;  %v711_v63 = vadd.f32 1.0, %v455_v52 }
  0x62   : > { %v457_v0 = vmul.f32 2.0, %v201_v53  ;;  %v205_v1 = vld [vmem:[%s1543_s30 + $0x218] sm:$0xff]  ;;  %v206_v2 = vld [vmem:[%s1543_s30 + $0x220] sm:$0xff]  ;;  %962 = vst [vmem:[%s1564_s17 + $0x1c0] sm:$0xff] %v706_v55  ;;  %963 = vst [vmem:[%s1564_s17 + $0x1c8] sm:$0xff] %v707_v56  ;;  %v712_v3 = vadd.f32 1.0, %v456_v58 }
  0x63   : > { %964 = vst [vmem:[%s1564_s17 + $0x1d0] sm:$0xff] %v708_v57  ;;  %v458_v4 = vmul.f32 2.0, %v202_v54  ;;  %v459_v5 = vmul.f32 2.0, %v203_v59  ;;  %v460_v6 = vmul.f32 2.0, %v204_v60  ;;  %v207_v7 = vld [vmem:[%s1543_s30 + $0x228] sm:$0xff]  ;;  %v208_v8 = vld [vmem:[%s1543_s30 + $0x230] sm:$0xff] }
  0x64   : > { %965 = vst [vmem:[%s1564_s17 + $0x1d8] sm:$0xff] %v709_v61  ;;  %966 = vst [vmem:[%s1564_s17 + $0x1e0] sm:$0xff] %v710_v62  ;;  %v713_v9 = vadd.f32 1.0, %v457_v0  ;;  %v461_v10 = vmul.f32 2.0, %v205_v1  ;;  %v462_v11 = vmul.f32 2.0, %v206_v2  ;;  %v463_v12 = vmul.f32 2.0, %v207_v7 }
  0x65   : > { %967 = vst [vmem:[%s1564_s17 + $0x1e8] sm:$0xff] %v711_v63  ;;  %v209_v13 = vld [vmem:[%s1543_s30 + $0x238] sm:$0xff]  ;;  %v210_v14 = vld [vmem:[%s1543_s30 + $0x240] sm:$0xff]  ;;  %968 = vst [vmem:[%s1564_s17 + $0x1f0] sm:$0xff] %v712_v3  ;;  %v714_v15 = vadd.f32 1.0, %v458_v4  ;;  %v715_v16 = vadd.f32 1.0, %v459_v5 }
  0x66   : > { %v716_v17 = vadd.f32 1.0, %v460_v6  ;;  %v464_v18 = vmul.f32 2.0, %v208_v8  ;;  %v211_v19 = vld [vmem:[%s1543_s30 + $0x248] sm:$0xff]  ;;  %v212_v20 = vld [vmem:[%s1543_s30 + $0x250] sm:$0xff]  ;;  %969 = vst [vmem:[%s1564_s17 + $0x1f8] sm:$0xff] %v713_v9  ;;  %v717_v21 = vadd.f32 1.0, %v461_v10 }
  0x67   : > { %v718_v22 = vadd.f32 1.0, %v462_v11  ;;  %v719_v23 = vadd.f32 1.0, %v463_v12  ;;  %v465_v24 = vmul.f32 2.0, %v209_v13  ;;  %v213_v25 = vld [vmem:[%s1543_s30 + $0x258] sm:$0xff]  ;;  %v214_v26 = vld [vmem:[%s1543_s30 + $0x260] sm:$0xff]  ;;  %970 = vst [vmem:[%s1564_s17 + $0x200] sm:$0xff] %v714_v15 }
  0x68   : > { %971 = vst [vmem:[%s1564_s17 + $0x208] sm:$0xff] %v715_v16  ;;  %972 = vst [vmem:[%s1564_s17 + $0x210] sm:$0xff] %v716_v17  ;;  %v720_v27 = vadd.f32 1.0, %v464_v18  ;;  %v466_v28 = vmul.f32 2.0, %v210_v14  ;;  %v467_v29 = vmul.f32 2.0, %v211_v19  ;;  %v468_v30 = vmul.f32 2.0, %v212_v20 }
  0x69   : > { %v215_v31 = vld [vmem:[%s1543_s30 + $0x268] sm:$0xff]  ;;  %v216_v32 = vld [vmem:[%s1543_s30 + $0x270] sm:$0xff]  ;;  %973 = vst [vmem:[%s1564_s17 + $0x218] sm:$0xff] %v717_v21  ;;  %974 = vst [vmem:[%s1564_s17 + $0x220] sm:$0xff] %v718_v22  ;;  %v721_v33 = vadd.f32 1.0, %v465_v24  ;;  %v469_v34 = vmul.f32 2.0, %v213_v25 }
  0x6a   : > { %975 = vst [vmem:[%s1564_s17 + $0x228] sm:$0xff] %v719_v23  ;;  %v470_v35 = vmul.f32 2.0, %v214_v26  ;;  %v471_v36 = vmul.f32 2.0, %v215_v31  ;;  %v217_v37 = vld [vmem:[%s1543_s30 + $0x278] sm:$0xff]  ;;  %v218_v38 = vld [vmem:[%s1543_s30 + $0x280] sm:$0xff]  ;;  %976 = vst [vmem:[%s1564_s17 + $0x230] sm:$0xff] %v720_v27 }
  0x6b   : > { %v722_v39 = vadd.f32 1.0, %v466_v28  ;;  %v723_v40 = vadd.f32 1.0, %v467_v29  ;;  %v724_v41 = vadd.f32 1.0, %v468_v30  ;;  %v472_v42 = vmul.f32 2.0, %v216_v32  ;;  %v219_v43 = vld [vmem:[%s1543_s30 + $0x288] sm:$0xff]  ;;  %v220_v44 = vld [vmem:[%s1543_s30 + $0x290] sm:$0xff] }
  0x6c   : > { %977 = vst [vmem:[%s1564_s17 + $0x238] sm:$0xff] %v721_v33  ;;  %v725_v45 = vadd.f32 1.0, %v469_v34  ;;  %v726_v46 = vadd.f32 1.0, %v470_v35  ;;  %v727_v47 = vadd.f32 1.0, %v471_v36  ;;  %v473_v48 = vmul.f32 2.0, %v217_v37  ;;  %v221_v49 = vld [vmem:[%s1543_s30 + $0x298] sm:$0xff] }
  0x6d   : > { %v222_v50 = vld [vmem:[%s1543_s30 + $0x2a0] sm:$0xff]  ;;  %978 = vst [vmem:[%s1564_s17 + $0x240] sm:$0xff] %v722_v39  ;;  %979 = vst [vmem:[%s1564_s17 + $0x248] sm:$0xff] %v723_v40  ;;  %v728_v51 = vadd.f32 1.0, %v472_v42  ;;  %v474_v52 = vmul.f32 2.0, %v218_v38  ;;  %v475_v53 = vmul.f32 2.0, %v219_v43 }
  0x6e   : > { %980 = vst [vmem:[%s1564_s17 + $0x250] sm:$0xff] %v724_v41  ;;  %v476_v54 = vmul.f32 2.0, %v220_v44  ;;  %v223_v55 = vld [vmem:[%s1543_s30 + $0x2a8] sm:$0xff]  ;;  %v224_v56 = vld [vmem:[%s1543_s30 + $0x2b0] sm:$0xff]  ;;  %981 = vst [vmem:[%s1564_s17 + $0x258] sm:$0xff] %v725_v45  ;;  %v729_v57 = vadd.f32 1.0, %v473_v48 }
  0x6f   : > { %982 = vst [vmem:[%s1564_s17 + $0x260] sm:$0xff] %v726_v46  ;;  %983 = vst [vmem:[%s1564_s17 + $0x268] sm:$0xff] %v727_v47  ;;  %v477_v58 = vmul.f32 2.0, %v221_v49  ;;  %v478_v59 = vmul.f32 2.0, %v222_v50  ;;  %v479_v60 = vmul.f32 2.0, %v223_v55  ;;  %v225_v61 = vld [vmem:[%s1543_s30 + $0x2b8] sm:$0xff] }
  0x70   : > { %v226_v62 = vld [vmem:[%s1543_s30 + $0x2c0] sm:$0xff]  ;;  %984 = vst [vmem:[%s1564_s17 + $0x270] sm:$0xff] %v728_v51  ;;  %v730_v63 = vadd.f32 1.0, %v474_v52  ;;  %v731_v0 = vadd.f32 1.0, %v475_v53  ;;  %v732_v1 = vadd.f32 1.0, %v476_v54  ;;  %v480_v2 = vmul.f32 2.0, %v224_v56 }
  0x71   : > { %v227_v3 = vld [vmem:[%s1543_s30 + $0x2c8] sm:$0xff]  ;;  %v228_v4 = vld [vmem:[%s1543_s30 + $0x2d0] sm:$0xff]  ;;  %985 = vst [vmem:[%s1564_s17 + $0x278] sm:$0xff] %v729_v57  ;;  %v733_v5 = vadd.f32 1.0, %v477_v58  ;;  %v734_v6 = vadd.f32 1.0, %v478_v59  ;;  %v735_v7 = vadd.f32 1.0, %v479_v60 }
  0x72   : > { %v481_v8 = vmul.f32 2.0, %v225_v61  ;;  %v229_v9 = vld [vmem:[%s1543_s30 + $0x2d8] sm:$0xff]  ;;  %v230_v10 = vld [vmem:[%s1543_s30 + $0x2e0] sm:$0xff]  ;;  %986 = vst [vmem:[%s1564_s17 + $0x280] sm:$0xff] %v730_v63  ;;  %987 = vst [vmem:[%s1564_s17 + $0x288] sm:$0xff] %v731_v0  ;;  %v736_v11 = vadd.f32 1.0, %v480_v2 }
  0x73   : > { %988 = vst [vmem:[%s1564_s17 + $0x290] sm:$0xff] %v732_v1  ;;  %v482_v12 = vmul.f32 2.0, %v226_v62  ;;  %v483_v13 = vmul.f32 2.0, %v227_v3  ;;  %v484_v14 = vmul.f32 2.0, %v228_v4  ;;  %v231_v15 = vld [vmem:[%s1543_s30 + $0x2e8] sm:$0xff]  ;;  %v232_v16 = vld [vmem:[%s1543_s30 + $0x2f0] sm:$0xff] }
  0x74   : > { %989 = vst [vmem:[%s1564_s17 + $0x298] sm:$0xff] %v733_v5  ;;  %990 = vst [vmem:[%s1564_s17 + $0x2a0] sm:$0xff] %v734_v6  ;;  %v737_v17 = vadd.f32 1.0, %v481_v8  ;;  %v485_v18 = vmul.f32 2.0, %v229_v9  ;;  %v486_v19 = vmul.f32 2.0, %v230_v10  ;;  %v487_v20 = vmul.f32 2.0, %v231_v15 }
  0x75   : > { %991 = vst [vmem:[%s1564_s17 + $0x2a8] sm:$0xff] %v735_v7  ;;  %v233_v21 = vld [vmem:[%s1543_s30 + $0x2f8] sm:$0xff]  ;;  %v234_v22 = vld [vmem:[%s1543_s30 + $0x300] sm:$0xff]  ;;  %992 = vst [vmem:[%s1564_s17 + $0x2b0] sm:$0xff] %v736_v11  ;;  %v738_v23 = vadd.f32 1.0, %v482_v12  ;;  %v739_v24 = vadd.f32 1.0, %v483_v13 }
  0x76   : > { %v740_v25 = vadd.f32 1.0, %v484_v14  ;;  %v488_v26 = vmul.f32 2.0, %v232_v16  ;;  %v235_v27 = vld [vmem:[%s1543_s30 + $0x308] sm:$0xff]  ;;  %v236_v28 = vld [vmem:[%s1543_s30 + $0x310] sm:$0xff]  ;;  %993 = vst [vmem:[%s1564_s17 + $0x2b8] sm:$0xff] %v737_v17  ;;  %v741_v29 = vadd.f32 1.0, %v485_v18 }
  0x77   : > { %v742_v30 = vadd.f32 1.0, %v486_v19  ;;  %v743_v31 = vadd.f32 1.0, %v487_v20  ;;  %v489_v32 = vmul.f32 2.0, %v233_v21  ;;  %v237_v33 = vld [vmem:[%s1543_s30 + $0x318] sm:$0xff]  ;;  %v238_v34 = vld [vmem:[%s1543_s30 + $0x320] sm:$0xff]  ;;  %994 = vst [vmem:[%s1564_s17 + $0x2c0] sm:$0xff] %v738_v23 }
  0x78   : > { %995 = vst [vmem:[%s1564_s17 + $0x2c8] sm:$0xff] %v739_v24  ;;  %996 = vst [vmem:[%s1564_s17 + $0x2d0] sm:$0xff] %v740_v25  ;;  %v744_v35 = vadd.f32 1.0, %v488_v26  ;;  %v490_v36 = vmul.f32 2.0, %v234_v22  ;;  %v491_v37 = vmul.f32 2.0, %v235_v27  ;;  %v492_v38 = vmul.f32 2.0, %v236_v28 }
  0x79   : > { %v239_v39 = vld [vmem:[%s1543_s30 + $0x328] sm:$0xff]  ;;  %v240_v40 = vld [vmem:[%s1543_s30 + $0x330] sm:$0xff]  ;;  %997 = vst [vmem:[%s1564_s17 + $0x2d8] sm:$0xff] %v741_v29  ;;  %998 = vst [vmem:[%s1564_s17 + $0x2e0] sm:$0xff] %v742_v30  ;;  %v745_v41 = vadd.f32 1.0, %v489_v32  ;;  %v493_v42 = vmul.f32 2.0, %v237_v33 }
  0x7a   : > { %999 = vst [vmem:[%s1564_s17 + $0x2e8] sm:$0xff] %v743_v31  ;;  %v494_v43 = vmul.f32 2.0, %v238_v34  ;;  %v495_v44 = vmul.f32 2.0, %v239_v39  ;;  %v241_v45 = vld [vmem:[%s1543_s30 + $0x338] sm:$0xff]  ;;  %v242_v46 = vld [vmem:[%s1543_s30 + $0x340] sm:$0xff]  ;;  %1000 = vst [vmem:[%s1564_s17 + $0x2f0] sm:$0xff] %v744_v35 }
  0x7b   : > { %v746_v47 = vadd.f32 1.0, %v490_v36  ;;  %v747_v48 = vadd.f32 1.0, %v491_v37  ;;  %v748_v49 = vadd.f32 1.0, %v492_v38  ;;  %v496_v50 = vmul.f32 2.0, %v240_v40  ;;  %v243_v51 = vld [vmem:[%s1543_s30 + $0x348] sm:$0xff]  ;;  %v244_v52 = vld [vmem:[%s1543_s30 + $0x350] sm:$0xff] }
  0x7c   : > { %1001 = vst [vmem:[%s1564_s17 + $0x2f8] sm:$0xff] %v745_v41  ;;  %v749_v53 = vadd.f32 1.0, %v493_v42  ;;  %v750_v54 = vadd.f32 1.0, %v494_v43  ;;  %v751_v55 = vadd.f32 1.0, %v495_v44  ;;  %v497_v56 = vmul.f32 2.0, %v241_v45  ;;  %v245_v57 = vld [vmem:[%s1543_s30 + $0x358] sm:$0xff] }
  0x7d   : > { %v246_v58 = vld [vmem:[%s1543_s30 + $0x360] sm:$0xff]  ;;  %1002 = vst [vmem:[%s1564_s17 + $0x300] sm:$0xff] %v746_v47  ;;  %1003 = vst [vmem:[%s1564_s17 + $0x308] sm:$0xff] %v747_v48  ;;  %v752_v59 = vadd.f32 1.0, %v496_v50  ;;  %v498_v60 = vmul.f32 2.0, %v242_v46  ;;  %v499_v61 = vmul.f32 2.0, %v243_v51 }
  0x7e   : > { %1004 = vst [vmem:[%s1564_s17 + $0x310] sm:$0xff] %v748_v49  ;;  %v500_v62 = vmul.f32 2.0, %v244_v52  ;;  %v247_v63 = vld [vmem:[%s1543_s30 + $0x368] sm:$0xff]  ;;  %v248_v0 = vld [vmem:[%s1543_s30 + $0x370] sm:$0xff]  ;;  %1005 = vst [vmem:[%s1564_s17 + $0x318] sm:$0xff] %v749_v53  ;;  %v753_v1 = vadd.f32 1.0, %v497_v56 }
  0x7f   : > { %1006 = vst [vmem:[%s1564_s17 + $0x320] sm:$0xff] %v750_v54  ;;  %1007 = vst [vmem:[%s1564_s17 + $0x328] sm:$0xff] %v751_v55  ;;  %v501_v2 = vmul.f32 2.0, %v245_v57  ;;  %v502_v3 = vmul.f32 2.0, %v246_v58  ;;  %v503_v4 = vmul.f32 2.0, %v247_v63  ;;  %v249_v5 = vld [vmem:[%s1543_s30 + $0x378] sm:$0xff] }
  0x80   : > { %v250_v6 = vld [vmem:[%s1543_s30 + $0x380] sm:$0xff]  ;;  %1008 = vst [vmem:[%s1564_s17 + $0x330] sm:$0xff] %v752_v59  ;;  %v754_v7 = vadd.f32 1.0, %v498_v60  ;;  %v755_v8 = vadd.f32 1.0, %v499_v61  ;;  %v756_v9 = vadd.f32 1.0, %v500_v62  ;;  %v504_v10 = vmul.f32 2.0, %v248_v0 }
  0x81   : > { %v251_v11 = vld [vmem:[%s1543_s30 + $0x388] sm:$0xff]  ;;  %v252_v12 = vld [vmem:[%s1543_s30 + $0x390] sm:$0xff]  ;;  %1009 = vst [vmem:[%s1564_s17 + $0x338] sm:$0xff] %v753_v1  ;;  %v757_v13 = vadd.f32 1.0, %v501_v2  ;;  %v758_v14 = vadd.f32 1.0, %v502_v3  ;;  %v759_v15 = vadd.f32 1.0, %v503_v4 }
  0x82   : > { %v505_v16 = vmul.f32 2.0, %v249_v5  ;;  %v253_v17 = vld [vmem:[%s1543_s30 + $0x398] sm:$0xff]  ;;  %v254_v18 = vld [vmem:[%s1543_s30 + $0x3a0] sm:$0xff]  ;;  %1010 = vst [vmem:[%s1564_s17 + $0x340] sm:$0xff] %v754_v7  ;;  %1011 = vst [vmem:[%s1564_s17 + $0x348] sm:$0xff] %v755_v8  ;;  %v760_v19 = vadd.f32 1.0, %v504_v10 }
  0x83   : > { %1012 = vst [vmem:[%s1564_s17 + $0x350] sm:$0xff] %v756_v9  ;;  %v506_v20 = vmul.f32 2.0, %v250_v6  ;;  %v507_v21 = vmul.f32 2.0, %v251_v11  ;;  %v508_v22 = vmul.f32 2.0, %v252_v12  ;;  %v255_v23 = vld [vmem:[%s1543_s30 + $0x3a8] sm:$0xff]  ;;  %v256_v24 = vld [vmem:[%s1543_s30 + $0x3b0] sm:$0xff] }
  0x84   : > { %1013 = vst [vmem:[%s1564_s17 + $0x358] sm:$0xff] %v757_v13  ;;  %1014 = vst [vmem:[%s1564_s17 + $0x360] sm:$0xff] %v758_v14  ;;  %v761_v25 = vadd.f32 1.0, %v505_v16  ;;  %v509_v26 = vmul.f32 2.0, %v253_v17  ;;  %v510_v27 = vmul.f32 2.0, %v254_v18  ;;  %v511_v28 = vmul.f32 2.0, %v255_v23 }
  0x85   : > { %1015 = vst [vmem:[%s1564_s17 + $0x368] sm:$0xff] %v759_v15  ;;  %v257_v29 = vld [vmem:[%s1543_s30 + $0x3b8] sm:$0xff]  ;;  %v258_v30 = vld [vmem:[%s1543_s30 + $0x3c0] sm:$0xff]  ;;  %1016 = vst [vmem:[%s1564_s17 + $0x370] sm:$0xff] %v760_v19  ;;  %v762_v31 = vadd.f32 1.0, %v506_v20  ;;  %v763_v32 = vadd.f32 1.0, %v507_v21 }
  0x86   : > { %v764_v33 = vadd.f32 1.0, %v508_v22  ;;  %v512_v34 = vmul.f32 2.0, %v256_v24  ;;  %v259_v35 = vld [vmem:[%s1543_s30 + $0x3c8] sm:$0xff]  ;;  %v260_v36 = vld [vmem:[%s1543_s30 + $0x3d0] sm:$0xff]  ;;  %1017 = vst [vmem:[%s1564_s17 + $0x378] sm:$0xff] %v761_v25  ;;  %v765_v37 = vadd.f32 1.0, %v509_v26 }
  0x87   : > { %v766_v38 = vadd.f32 1.0, %v510_v27  ;;  %v767_v39 = vadd.f32 1.0, %v511_v28  ;;  %v513_v40 = vmul.f32 2.0, %v257_v29  ;;  %v261_v41 = vld [vmem:[%s1543_s30 + $0x3d8] sm:$0xff]  ;;  %v262_v42 = vld [vmem:[%s1543_s30 + $0x3e0] sm:$0xff]  ;;  %1018 = vst [vmem:[%s1564_s17 + $0x380] sm:$0xff] %v762_v31 }
  0x88   : > { %1019 = vst [vmem:[%s1564_s17 + $0x388] sm:$0xff] %v763_v32  ;;  %1020 = vst [vmem:[%s1564_s17 + $0x390] sm:$0xff] %v764_v33  ;;  %v768_v43 = vadd.f32 1.0, %v512_v34  ;;  %v514_v44 = vmul.f32 2.0, %v258_v30  ;;  %v515_v45 = vmul.f32 2.0, %v259_v35  ;;  %v516_v46 = vmul.f32 2.0, %v260_v36 }
  0x89   : > { %v263_v47 = vld [vmem:[%s1543_s30 + $0x3e8] sm:$0xff]  ;;  %v264_v48 = vld [vmem:[%s1543_s30 + $0x3f0] sm:$0xff]  ;;  %1021 = vst [vmem:[%s1564_s17 + $0x398] sm:$0xff] %v765_v37  ;;  %1022 = vst [vmem:[%s1564_s17 + $0x3a0] sm:$0xff] %v766_v38  ;;  %v769_v49 = vadd.f32 1.0, %v513_v40  ;;  %v517_v50 = vmul.f32 2.0, %v261_v41 }
  0x8a   : > { %1023 = vst [vmem:[%s1564_s17 + $0x3a8] sm:$0xff] %v767_v39  ;;  %v518_v51 = vmul.f32 2.0, %v262_v42  ;;  %v519_v52 = vmul.f32 2.0, %v263_v47  ;;  %v265_v53 = vld [vmem:[%s1543_s30 + $0x3f8] sm:$0xff]  ;;  %v266_v54 = vld [vmem:[%s1543_s30 + $0x400] sm:$0xff]  ;;  %1024 = vst [vmem:[%s1564_s17 + $0x3b0] sm:$0xff] %v768_v43 }
  0x8b   : > { %v770_v55 = vadd.f32 1.0, %v514_v44  ;;  %v771_v56 = vadd.f32 1.0, %v515_v45  ;;  %v772_v57 = vadd.f32 1.0, %v516_v46  ;;  %v520_v58 = vmul.f32 2.0, %v264_v48  ;;  %v267_v59 = vld [vmem:[%s1543_s30 + $0x408] sm:$0xff]  ;;  %v268_v60 = vld [vmem:[%s1543_s30 + $0x410] sm:$0xff] }
  0x8c   : > { %1025 = vst [vmem:[%s1564_s17 + $0x3b8] sm:$0xff] %v769_v49  ;;  %v773_v61 = vadd.f32 1.0, %v517_v50  ;;  %v774_v62 = vadd.f32 1.0, %v518_v51  ;;  %v775_v63 = vadd.f32 1.0, %v519_v52  ;;  %v521_v0 = vmul.f32 2.0, %v265_v53  ;;  %v269_v1 = vld [vmem:[%s1543_s30 + $0x418] sm:$0xff] }
  0x8d   : > { %v270_v2 = vld [vmem:[%s1543_s30 + $0x420] sm:$0xff]  ;;  %1026 = vst [vmem:[%s1564_s17 + $0x3c0] sm:$0xff] %v770_v55  ;;  %1027 = vst [vmem:[%s1564_s17 + $0x3c8] sm:$0xff] %v771_v56  ;;  %v776_v3 = vadd.f32 1.0, %v520_v58  ;;  %v522_v4 = vmul.f32 2.0, %v266_v54  ;;  %v523_v5 = vmul.f32 2.0, %v267_v59 }
  0x8e   : > { %1028 = vst [vmem:[%s1564_s17 + $0x3d0] sm:$0xff] %v772_v57  ;;  %v524_v6 = vmul.f32 2.0, %v268_v60  ;;  %v271_v7 = vld [vmem:[%s1543_s30 + $0x428] sm:$0xff]  ;;  %v272_v8 = vld [vmem:[%s1543_s30 + $0x430] sm:$0xff]  ;;  %1029 = vst [vmem:[%s1564_s17 + $0x3d8] sm:$0xff] %v773_v61  ;;  %v777_v9 = vadd.f32 1.0, %v521_v0 }
  0x8f   : > { %1030 = vst [vmem:[%s1564_s17 + $0x3e0] sm:$0xff] %v774_v62  ;;  %1031 = vst [vmem:[%s1564_s17 + $0x3e8] sm:$0xff] %v775_v63  ;;  %v525_v10 = vmul.f32 2.0, %v269_v1  ;;  %v526_v11 = vmul.f32 2.0, %v270_v2  ;;  %v527_v12 = vmul.f32 2.0, %v271_v7  ;;  %v273_v13 = vld [vmem:[%s1543_s30 + $0x438] sm:$0xff] }
  0x90   : > { %v274_v14 = vld [vmem:[%s1543_s30 + $0x440] sm:$0xff]  ;;  %1032 = vst [vmem:[%s1564_s17 + $0x3f0] sm:$0xff] %v776_v3  ;;  %v778_v15 = vadd.f32 1.0, %v522_v4  ;;  %v779_v16 = vadd.f32 1.0, %v523_v5  ;;  %v780_v17 = vadd.f32 1.0, %v524_v6  ;;  %v528_v18 = vmul.f32 2.0, %v272_v8 }
  0x91   : > { %v275_v19 = vld [vmem:[%s1543_s30 + $0x448] sm:$0xff]  ;;  %v276_v20 = vld [vmem:[%s1543_s30 + $0x450] sm:$0xff]  ;;  %1033 = vst [vmem:[%s1564_s17 + $0x3f8] sm:$0xff] %v777_v9  ;;  %v781_v21 = vadd.f32 1.0, %v525_v10  ;;  %v782_v22 = vadd.f32 1.0, %v526_v11  ;;  %v783_v23 = vadd.f32 1.0, %v527_v12 }
  0x92   : > { %v529_v24 = vmul.f32 2.0, %v273_v13  ;;  %v277_v25 = vld [vmem:[%s1543_s30 + $0x458] sm:$0xff]  ;;  %v278_v26 = vld [vmem:[%s1543_s30 + $0x460] sm:$0xff]  ;;  %1034 = vst [vmem:[%s1564_s17 + $0x400] sm:$0xff] %v778_v15  ;;  %1035 = vst [vmem:[%s1564_s17 + $0x408] sm:$0xff] %v779_v16  ;;  %v784_v27 = vadd.f32 1.0, %v528_v18 }
  0x93   : > { %1036 = vst [vmem:[%s1564_s17 + $0x410] sm:$0xff] %v780_v17  ;;  %v530_v28 = vmul.f32 2.0, %v274_v14  ;;  %v531_v29 = vmul.f32 2.0, %v275_v19  ;;  %v532_v30 = vmul.f32 2.0, %v276_v20  ;;  %v279_v31 = vld [vmem:[%s1543_s30 + $0x468] sm:$0xff]  ;;  %v280_v32 = vld [vmem:[%s1543_s30 + $0x470] sm:$0xff] }
  0x94   : > { %1037 = vst [vmem:[%s1564_s17 + $0x418] sm:$0xff] %v781_v21  ;;  %1038 = vst [vmem:[%s1564_s17 + $0x420] sm:$0xff] %v782_v22  ;;  %v785_v33 = vadd.f32 1.0, %v529_v24  ;;  %v533_v34 = vmul.f32 2.0, %v277_v25  ;;  %v534_v35 = vmul.f32 2.0, %v278_v26  ;;  %v535_v36 = vmul.f32 2.0, %v279_v31 }
  0x95   : > { %1039 = vst [vmem:[%s1564_s17 + $0x428] sm:$0xff] %v783_v23  ;;  %v281_v37 = vld [vmem:[%s1543_s30 + $0x478] sm:$0xff]  ;;  %v282_v38 = vld [vmem:[%s1543_s30 + $0x480] sm:$0xff]  ;;  %1040 = vst [vmem:[%s1564_s17 + $0x430] sm:$0xff] %v784_v27  ;;  %v786_v39 = vadd.f32 1.0, %v530_v28  ;;  %v787_v40 = vadd.f32 1.0, %v531_v29 }
  0x96   : > { %v788_v41 = vadd.f32 1.0, %v532_v30  ;;  %v536_v42 = vmul.f32 2.0, %v280_v32  ;;  %v283_v43 = vld [vmem:[%s1543_s30 + $0x488] sm:$0xff]  ;;  %v284_v44 = vld [vmem:[%s1543_s30 + $0x490] sm:$0xff]  ;;  %1041 = vst [vmem:[%s1564_s17 + $0x438] sm:$0xff] %v785_v33  ;;  %v789_v45 = vadd.f32 1.0, %v533_v34 }
  0x97   : > { %v790_v46 = vadd.f32 1.0, %v534_v35  ;;  %v791_v47 = vadd.f32 1.0, %v535_v36  ;;  %v537_v48 = vmul.f32 2.0, %v281_v37  ;;  %v285_v49 = vld [vmem:[%s1543_s30 + $0x498] sm:$0xff]  ;;  %v286_v50 = vld [vmem:[%s1543_s30 + $0x4a0] sm:$0xff]  ;;  %1042 = vst [vmem:[%s1564_s17 + $0x440] sm:$0xff] %v786_v39 }
  0x98   : > { %1043 = vst [vmem:[%s1564_s17 + $0x448] sm:$0xff] %v787_v40  ;;  %1044 = vst [vmem:[%s1564_s17 + $0x450] sm:$0xff] %v788_v41  ;;  %v792_v51 = vadd.f32 1.0, %v536_v42  ;;  %v538_v52 = vmul.f32 2.0, %v282_v38  ;;  %v539_v53 = vmul.f32 2.0, %v283_v43  ;;  %v540_v54 = vmul.f32 2.0, %v284_v44 }
  0x99   : > { %v287_v55 = vld [vmem:[%s1543_s30 + $0x4a8] sm:$0xff]  ;;  %v288_v56 = vld [vmem:[%s1543_s30 + $0x4b0] sm:$0xff]  ;;  %1045 = vst [vmem:[%s1564_s17 + $0x458] sm:$0xff] %v789_v45  ;;  %1046 = vst [vmem:[%s1564_s17 + $0x460] sm:$0xff] %v790_v46  ;;  %v793_v57 = vadd.f32 1.0, %v537_v48  ;;  %v541_v58 = vmul.f32 2.0, %v285_v49 }
  0x9a   : > { %1047 = vst [vmem:[%s1564_s17 + $0x468] sm:$0xff] %v791_v47  ;;  %v542_v59 = vmul.f32 2.0, %v286_v50  ;;  %v543_v60 = vmul.f32 2.0, %v287_v55  ;;  %v289_v61 = vld [vmem:[%s1543_s30 + $0x4b8] sm:$0xff]  ;;  %v290_v62 = vld [vmem:[%s1543_s30 + $0x4c0] sm:$0xff]  ;;  %1048 = vst [vmem:[%s1564_s17 + $0x470] sm:$0xff] %v792_v51 }
  0x9b   : > { %v794_v63 = vadd.f32 1.0, %v538_v52  ;;  %v795_v0 = vadd.f32 1.0, %v539_v53  ;;  %v796_v1 = vadd.f32 1.0, %v540_v54  ;;  %v544_v2 = vmul.f32 2.0, %v288_v56  ;;  %v291_v3 = vld [vmem:[%s1543_s30 + $0x4c8] sm:$0xff]  ;;  %v292_v4 = vld [vmem:[%s1543_s30 + $0x4d0] sm:$0xff] }
  0x9c   : > { %1049 = vst [vmem:[%s1564_s17 + $0x478] sm:$0xff] %v793_v57  ;;  %v797_v5 = vadd.f32 1.0, %v541_v58  ;;  %v798_v6 = vadd.f32 1.0, %v542_v59  ;;  %v799_v7 = vadd.f32 1.0, %v543_v60  ;;  %v545_v8 = vmul.f32 2.0, %v289_v61  ;;  %v293_v9 = vld [vmem:[%s1543_s30 + $0x4d8] sm:$0xff] }
  0x9d   : > { %v294_v10 = vld [vmem:[%s1543_s30 + $0x4e0] sm:$0xff]  ;;  %1050 = vst [vmem:[%s1564_s17 + $0x480] sm:$0xff] %v794_v63  ;;  %1051 = vst [vmem:[%s1564_s17 + $0x488] sm:$0xff] %v795_v0  ;;  %v800_v11 = vadd.f32 1.0, %v544_v2  ;;  %v546_v12 = vmul.f32 2.0, %v290_v62  ;;  %v547_v13 = vmul.f32 2.0, %v291_v3 }
  0x9e   : > { %1052 = vst [vmem:[%s1564_s17 + $0x490] sm:$0xff] %v796_v1  ;;  %v548_v14 = vmul.f32 2.0, %v292_v4  ;;  %v295_v15 = vld [vmem:[%s1543_s30 + $0x4e8] sm:$0xff]  ;;  %v296_v16 = vld [vmem:[%s1543_s30 + $0x4f0] sm:$0xff]  ;;  %1053 = vst [vmem:[%s1564_s17 + $0x498] sm:$0xff] %v797_v5  ;;  %v801_v17 = vadd.f32 1.0, %v545_v8 }
  0x9f   : > { %1054 = vst [vmem:[%s1564_s17 + $0x4a0] sm:$0xff] %v798_v6  ;;  %1055 = vst [vmem:[%s1564_s17 + $0x4a8] sm:$0xff] %v799_v7  ;;  %v549_v18 = vmul.f32 2.0, %v293_v9  ;;  %v550_v19 = vmul.f32 2.0, %v294_v10  ;;  %v551_v20 = vmul.f32 2.0, %v295_v15  ;;  %v297_v21 = vld [vmem:[%s1543_s30 + $0x4f8] sm:$0xff] }
  0xa0   : > { %v298_v22 = vld [vmem:[%s1543_s30 + $0x500] sm:$0xff]  ;;  %1056 = vst [vmem:[%s1564_s17 + $0x4b0] sm:$0xff] %v800_v11  ;;  %v802_v23 = vadd.f32 1.0, %v546_v12  ;;  %v803_v24 = vadd.f32 1.0, %v547_v13  ;;  %v804_v25 = vadd.f32 1.0, %v548_v14  ;;  %v552_v26 = vmul.f32 2.0, %v296_v16 }
  0xa1   : > { %v299_v27 = vld [vmem:[%s1543_s30 + $0x508] sm:$0xff]  ;;  %v300_v28 = vld [vmem:[%s1543_s30 + $0x510] sm:$0xff]  ;;  %1057 = vst [vmem:[%s1564_s17 + $0x4b8] sm:$0xff] %v801_v17  ;;  %v805_v29 = vadd.f32 1.0, %v549_v18  ;;  %v806_v30 = vadd.f32 1.0, %v550_v19  ;;  %v807_v31 = vadd.f32 1.0, %v551_v20 }
  0xa2   : > { %v553_v32 = vmul.f32 2.0, %v297_v21  ;;  %v301_v33 = vld [vmem:[%s1543_s30 + $0x518] sm:$0xff]  ;;  %v302_v34 = vld [vmem:[%s1543_s30 + $0x520] sm:$0xff]  ;;  %1058 = vst [vmem:[%s1564_s17 + $0x4c0] sm:$0xff] %v802_v23  ;;  %1059 = vst [vmem:[%s1564_s17 + $0x4c8] sm:$0xff] %v803_v24  ;;  %v808_v35 = vadd.f32 1.0, %v552_v26 }
  0xa3   : > { %1060 = vst [vmem:[%s1564_s17 + $0x4d0] sm:$0xff] %v804_v25  ;;  %v554_v36 = vmul.f32 2.0, %v298_v22  ;;  %v555_v37 = vmul.f32 2.0, %v299_v27  ;;  %v556_v38 = vmul.f32 2.0, %v300_v28  ;;  %v303_v39 = vld [vmem:[%s1543_s30 + $0x528] sm:$0xff]  ;;  %v304_v40 = vld [vmem:[%s1543_s30 + $0x530] sm:$0xff] }
  0xa4   : > { %1061 = vst [vmem:[%s1564_s17 + $0x4d8] sm:$0xff] %v805_v29  ;;  %1062 = vst [vmem:[%s1564_s17 + $0x4e0] sm:$0xff] %v806_v30  ;;  %v809_v41 = vadd.f32 1.0, %v553_v32  ;;  %v557_v42 = vmul.f32 2.0, %v301_v33  ;;  %v558_v43 = vmul.f32 2.0, %v302_v34  ;;  %v559_v44 = vmul.f32 2.0, %v303_v39 }
  0xa5   : > { %1063 = vst [vmem:[%s1564_s17 + $0x4e8] sm:$0xff] %v807_v31  ;;  %v305_v45 = vld [vmem:[%s1543_s30 + $0x538] sm:$0xff]  ;;  %v306_v46 = vld [vmem:[%s1543_s30 + $0x540] sm:$0xff]  ;;  %1064 = vst [vmem:[%s1564_s17 + $0x4f0] sm:$0xff] %v808_v35  ;;  %v810_v47 = vadd.f32 1.0, %v554_v36  ;;  %v811_v48 = vadd.f32 1.0, %v555_v37 }
  0xa6   : > { %v812_v49 = vadd.f32 1.0, %v556_v38  ;;  %v560_v50 = vmul.f32 2.0, %v304_v40  ;;  %v307_v51 = vld [vmem:[%s1543_s30 + $0x548] sm:$0xff]  ;;  %v308_v52 = vld [vmem:[%s1543_s30 + $0x550] sm:$0xff]  ;;  %1065 = vst [vmem:[%s1564_s17 + $0x4f8] sm:$0xff] %v809_v41  ;;  %v813_v53 = vadd.f32 1.0, %v557_v42 }
  0xa7   : > { %v814_v54 = vadd.f32 1.0, %v558_v43  ;;  %v815_v55 = vadd.f32 1.0, %v559_v44  ;;  %v561_v56 = vmul.f32 2.0, %v305_v45  ;;  %v309_v57 = vld [vmem:[%s1543_s30 + $0x558] sm:$0xff]  ;;  %v310_v58 = vld [vmem:[%s1543_s30 + $0x560] sm:$0xff]  ;;  %1066 = vst [vmem:[%s1564_s17 + $0x500] sm:$0xff] %v810_v47 }
  0xa8   : > { %1067 = vst [vmem:[%s1564_s17 + $0x508] sm:$0xff] %v811_v48  ;;  %1068 = vst [vmem:[%s1564_s17 + $0x510] sm:$0xff] %v812_v49  ;;  %v816_v59 = vadd.f32 1.0, %v560_v50  ;;  %v562_v60 = vmul.f32 2.0, %v306_v46  ;;  %v563_v61 = vmul.f32 2.0, %v307_v51  ;;  %v564_v62 = vmul.f32 2.0, %v308_v52 }
  0xa9   : > { %v311_v63 = vld [vmem:[%s1543_s30 + $0x568] sm:$0xff]  ;;  %v312_v0 = vld [vmem:[%s1543_s30 + $0x570] sm:$0xff]  ;;  %1069 = vst [vmem:[%s1564_s17 + $0x518] sm:$0xff] %v813_v53  ;;  %1070 = vst [vmem:[%s1564_s17 + $0x520] sm:$0xff] %v814_v54  ;;  %v817_v1 = vadd.f32 1.0, %v561_v56  ;;  %v565_v2 = vmul.f32 2.0, %v309_v57 }
  0xaa   : > { %1071 = vst [vmem:[%s1564_s17 + $0x528] sm:$0xff] %v815_v55  ;;  %v566_v3 = vmul.f32 2.0, %v310_v58  ;;  %v567_v4 = vmul.f32 2.0, %v311_v63  ;;  %v313_v5 = vld [vmem:[%s1543_s30 + $0x578] sm:$0xff]  ;;  %v314_v6 = vld [vmem:[%s1543_s30 + $0x580] sm:$0xff]  ;;  %1072 = vst [vmem:[%s1564_s17 + $0x530] sm:$0xff] %v816_v59 }
  0xab   : > { %v818_v7 = vadd.f32 1.0, %v562_v60  ;;  %v819_v8 = vadd.f32 1.0, %v563_v61  ;;  %v820_v9 = vadd.f32 1.0, %v564_v62  ;;  %v568_v10 = vmul.f32 2.0, %v312_v0  ;;  %v315_v11 = vld [vmem:[%s1543_s30 + $0x588] sm:$0xff]  ;;  %v316_v12 = vld [vmem:[%s1543_s30 + $0x590] sm:$0xff] }
  0xac   : > { %1073 = vst [vmem:[%s1564_s17 + $0x538] sm:$0xff] %v817_v1  ;;  %v821_v13 = vadd.f32 1.0, %v565_v2  ;;  %v822_v14 = vadd.f32 1.0, %v566_v3  ;;  %v823_v15 = vadd.f32 1.0, %v567_v4  ;;  %v569_v16 = vmul.f32 2.0, %v313_v5  ;;  %v317_v17 = vld [vmem:[%s1543_s30 + $0x598] sm:$0xff] }
  0xad   : > { %v318_v18 = vld [vmem:[%s1543_s30 + $0x5a0] sm:$0xff]  ;;  %1074 = vst [vmem:[%s1564_s17 + $0x540] sm:$0xff] %v818_v7  ;;  %1075 = vst [vmem:[%s1564_s17 + $0x548] sm:$0xff] %v819_v8  ;;  %v824_v19 = vadd.f32 1.0, %v568_v10  ;;  %v570_v20 = vmul.f32 2.0, %v314_v6  ;;  %v571_v21 = vmul.f32 2.0, %v315_v11 }
  0xae   : > { %1076 = vst [vmem:[%s1564_s17 + $0x550] sm:$0xff] %v820_v9  ;;  %v572_v22 = vmul.f32 2.0, %v316_v12  ;;  %v319_v23 = vld [vmem:[%s1543_s30 + $0x5a8] sm:$0xff]  ;;  %v320_v24 = vld [vmem:[%s1543_s30 + $0x5b0] sm:$0xff]  ;;  %1077 = vst [vmem:[%s1564_s17 + $0x558] sm:$0xff] %v821_v13  ;;  %v825_v25 = vadd.f32 1.0, %v569_v16 }
  0xaf   : > { %1078 = vst [vmem:[%s1564_s17 + $0x560] sm:$0xff] %v822_v14  ;;  %1079 = vst [vmem:[%s1564_s17 + $0x568] sm:$0xff] %v823_v15  ;;  %v573_v26 = vmul.f32 2.0, %v317_v17  ;;  %v574_v27 = vmul.f32 2.0, %v318_v18  ;;  %v575_v28 = vmul.f32 2.0, %v319_v23  ;;  %v321_v29 = vld [vmem:[%s1543_s30 + $0x5b8] sm:$0xff] }
  0xb0   : > { %v322_v30 = vld [vmem:[%s1543_s30 + $0x5c0] sm:$0xff]  ;;  %1080 = vst [vmem:[%s1564_s17 + $0x570] sm:$0xff] %v824_v19  ;;  %v826_v31 = vadd.f32 1.0, %v570_v20  ;;  %v827_v32 = vadd.f32 1.0, %v571_v21  ;;  %v828_v33 = vadd.f32 1.0, %v572_v22  ;;  %v576_v34 = vmul.f32 2.0, %v320_v24 }
  0xb1   : > { %v323_v35 = vld [vmem:[%s1543_s30 + $0x5c8] sm:$0xff]  ;;  %v324_v36 = vld [vmem:[%s1543_s30 + $0x5d0] sm:$0xff]  ;;  %1081 = vst [vmem:[%s1564_s17 + $0x578] sm:$0xff] %v825_v25  ;;  %v829_v37 = vadd.f32 1.0, %v573_v26  ;;  %v830_v38 = vadd.f32 1.0, %v574_v27  ;;  %v831_v39 = vadd.f32 1.0, %v575_v28 }
  0xb2   : > { %v577_v40 = vmul.f32 2.0, %v321_v29  ;;  %v325_v41 = vld [vmem:[%s1543_s30 + $0x5d8] sm:$0xff]  ;;  %v326_v42 = vld [vmem:[%s1543_s30 + $0x5e0] sm:$0xff]  ;;  %1082 = vst [vmem:[%s1564_s17 + $0x580] sm:$0xff] %v826_v31  ;;  %1083 = vst [vmem:[%s1564_s17 + $0x588] sm:$0xff] %v827_v32  ;;  %v832_v43 = vadd.f32 1.0, %v576_v34 }
  0xb3   : > { %1084 = vst [vmem:[%s1564_s17 + $0x590] sm:$0xff] %v828_v33  ;;  %v578_v44 = vmul.f32 2.0, %v322_v30  ;;  %v579_v45 = vmul.f32 2.0, %v323_v35  ;;  %v580_v46 = vmul.f32 2.0, %v324_v36  ;;  %v327_v47 = vld [vmem:[%s1543_s30 + $0x5e8] sm:$0xff]  ;;  %v328_v48 = vld [vmem:[%s1543_s30 + $0x5f0] sm:$0xff] }
  0xb4   : > { %1085 = vst [vmem:[%s1564_s17 + $0x598] sm:$0xff] %v829_v37  ;;  %1086 = vst [vmem:[%s1564_s17 + $0x5a0] sm:$0xff] %v830_v38  ;;  %v833_v49 = vadd.f32 1.0, %v577_v40  ;;  %v581_v50 = vmul.f32 2.0, %v325_v41  ;;  %v582_v51 = vmul.f32 2.0, %v326_v42  ;;  %v583_v52 = vmul.f32 2.0, %v327_v47 }
  0xb5   : > { %1087 = vst [vmem:[%s1564_s17 + $0x5a8] sm:$0xff] %v831_v39  ;;  %v329_v53 = vld [vmem:[%s1543_s30 + $0x5f8] sm:$0xff]  ;;  %v330_v54 = vld [vmem:[%s1543_s30 + $0x600] sm:$0xff]  ;;  %1088 = vst [vmem:[%s1564_s17 + $0x5b0] sm:$0xff] %v832_v43  ;;  %v834_v55 = vadd.f32 1.0, %v578_v44  ;;  %v835_v56 = vadd.f32 1.0, %v579_v45 }
  0xb6   : > { %v836_v57 = vadd.f32 1.0, %v580_v46  ;;  %v584_v58 = vmul.f32 2.0, %v328_v48  ;;  %v331_v59 = vld [vmem:[%s1543_s30 + $0x608] sm:$0xff]  ;;  %v332_v60 = vld [vmem:[%s1543_s30 + $0x610] sm:$0xff]  ;;  %1089 = vst [vmem:[%s1564_s17 + $0x5b8] sm:$0xff] %v833_v49  ;;  %v837_v61 = vadd.f32 1.0, %v581_v50 }
  0xb7   : > { %v838_v62 = vadd.f32 1.0, %v582_v51  ;;  %v839_v63 = vadd.f32 1.0, %v583_v52  ;;  %v585_v0 = vmul.f32 2.0, %v329_v53  ;;  %v333_v1 = vld [vmem:[%s1543_s30 + $0x618] sm:$0xff]  ;;  %v334_v2 = vld [vmem:[%s1543_s30 + $0x620] sm:$0xff]  ;;  %1090 = vst [vmem:[%s1564_s17 + $0x5c0] sm:$0xff] %v834_v55 }
  0xb8   : > { %1091 = vst [vmem:[%s1564_s17 + $0x5c8] sm:$0xff] %v835_v56  ;;  %1092 = vst [vmem:[%s1564_s17 + $0x5d0] sm:$0xff] %v836_v57  ;;  %v840_v3 = vadd.f32 1.0, %v584_v58  ;;  %v586_v4 = vmul.f32 2.0, %v330_v54  ;;  %v587_v5 = vmul.f32 2.0, %v331_v59  ;;  %v588_v6 = vmul.f32 2.0, %v332_v60 }
  0xb9   : > { %v335_v7 = vld [vmem:[%s1543_s30 + $0x628] sm:$0xff]  ;;  %v336_v8 = vld [vmem:[%s1543_s30 + $0x630] sm:$0xff]  ;;  %1093 = vst [vmem:[%s1564_s17 + $0x5d8] sm:$0xff] %v837_v61  ;;  %1094 = vst [vmem:[%s1564_s17 + $0x5e0] sm:$0xff] %v838_v62  ;;  %v841_v9 = vadd.f32 1.0, %v585_v0  ;;  %v589_v10 = vmul.f32 2.0, %v333_v1 }
  0xba   : > { %1095 = vst [vmem:[%s1564_s17 + $0x5e8] sm:$0xff] %v839_v63  ;;  %v590_v11 = vmul.f32 2.0, %v334_v2  ;;  %v591_v12 = vmul.f32 2.0, %v335_v7  ;;  %v337_v13 = vld [vmem:[%s1543_s30 + $0x638] sm:$0xff]  ;;  %v338_v14 = vld [vmem:[%s1543_s30 + $0x640] sm:$0xff]  ;;  %1096 = vst [vmem:[%s1564_s17 + $0x5f0] sm:$0xff] %v840_v3 }
  0xbb   : > { %v842_v15 = vadd.f32 1.0, %v586_v4  ;;  %v843_v16 = vadd.f32 1.0, %v587_v5  ;;  %v844_v17 = vadd.f32 1.0, %v588_v6  ;;  %v592_v18 = vmul.f32 2.0, %v336_v8  ;;  %v339_v19 = vld [vmem:[%s1543_s30 + $0x648] sm:$0xff]  ;;  %v340_v20 = vld [vmem:[%s1543_s30 + $0x650] sm:$0xff] }
  0xbc   : > { %1097 = vst [vmem:[%s1564_s17 + $0x5f8] sm:$0xff] %v841_v9  ;;  %v845_v21 = vadd.f32 1.0, %v589_v10  ;;  %v846_v22 = vadd.f32 1.0, %v590_v11  ;;  %v847_v23 = vadd.f32 1.0, %v591_v12  ;;  %v593_v24 = vmul.f32 2.0, %v337_v13  ;;  %v341_v25 = vld [vmem:[%s1543_s30 + $0x658] sm:$0xff] }
  0xbd   : > { %v342_v26 = vld [vmem:[%s1543_s30 + $0x660] sm:$0xff]  ;;  %1098 = vst [vmem:[%s1564_s17 + $0x600] sm:$0xff] %v842_v15  ;;  %1099 = vst [vmem:[%s1564_s17 + $0x608] sm:$0xff] %v843_v16  ;;  %v848_v27 = vadd.f32 1.0, %v592_v18  ;;  %v594_v28 = vmul.f32 2.0, %v338_v14  ;;  %v595_v29 = vmul.f32 2.0, %v339_v19 }
  0xbe   : > { %1100 = vst [vmem:[%s1564_s17 + $0x610] sm:$0xff] %v844_v17  ;;  %v596_v30 = vmul.f32 2.0, %v340_v20  ;;  %v343_v31 = vld [vmem:[%s1543_s30 + $0x668] sm:$0xff]  ;;  %v344_v32 = vld [vmem:[%s1543_s30 + $0x670] sm:$0xff]  ;;  %1101 = vst [vmem:[%s1564_s17 + $0x618] sm:$0xff] %v845_v21  ;;  %v849_v33 = vadd.f32 1.0, %v593_v24 }
  0xbf   : > { %1102 = vst [vmem:[%s1564_s17 + $0x620] sm:$0xff] %v846_v22  ;;  %1103 = vst [vmem:[%s1564_s17 + $0x628] sm:$0xff] %v847_v23  ;;  %v597_v34 = vmul.f32 2.0, %v341_v25  ;;  %v598_v35 = vmul.f32 2.0, %v342_v26  ;;  %v599_v36 = vmul.f32 2.0, %v343_v31  ;;  %v345_v37 = vld [vmem:[%s1543_s30 + $0x678] sm:$0xff] }
  0xc0   : > { %v346_v38 = vld [vmem:[%s1543_s30 + $0x680] sm:$0xff]  ;;  %1104 = vst [vmem:[%s1564_s17 + $0x630] sm:$0xff] %v848_v27  ;;  %v850_v39 = vadd.f32 1.0, %v594_v28  ;;  %v851_v40 = vadd.f32 1.0, %v595_v29  ;;  %v852_v41 = vadd.f32 1.0, %v596_v30  ;;  %v600_v42 = vmul.f32 2.0, %v344_v32 }
  0xc1   : > { %v347_v43 = vld [vmem:[%s1543_s30 + $0x688] sm:$0xff]  ;;  %v348_v44 = vld [vmem:[%s1543_s30 + $0x690] sm:$0xff]  ;;  %1105 = vst [vmem:[%s1564_s17 + $0x638] sm:$0xff] %v849_v33  ;;  %v853_v45 = vadd.f32 1.0, %v597_v34  ;;  %v854_v46 = vadd.f32 1.0, %v598_v35  ;;  %v855_v47 = vadd.f32 1.0, %v599_v36 }
  0xc2   : > { %v601_v48 = vmul.f32 2.0, %v345_v37  ;;  %v349_v49 = vld [vmem:[%s1543_s30 + $0x698] sm:$0xff]  ;;  %v350_v50 = vld [vmem:[%s1543_s30 + $0x6a0] sm:$0xff]  ;;  %1106 = vst [vmem:[%s1564_s17 + $0x640] sm:$0xff] %v850_v39  ;;  %1107 = vst [vmem:[%s1564_s17 + $0x648] sm:$0xff] %v851_v40  ;;  %v856_v51 = vadd.f32 1.0, %v600_v42 }
  0xc3   : > { %1108 = vst [vmem:[%s1564_s17 + $0x650] sm:$0xff] %v852_v41  ;;  %v602_v52 = vmul.f32 2.0, %v346_v38  ;;  %v603_v53 = vmul.f32 2.0, %v347_v43  ;;  %v604_v54 = vmul.f32 2.0, %v348_v44  ;;  %v351_v55 = vld [vmem:[%s1543_s30 + $0x6a8] sm:$0xff]  ;;  %v352_v56 = vld [vmem:[%s1543_s30 + $0x6b0] sm:$0xff] }
  0xc4   : > { %1109 = vst [vmem:[%s1564_s17 + $0x658] sm:$0xff] %v853_v45  ;;  %1110 = vst [vmem:[%s1564_s17 + $0x660] sm:$0xff] %v854_v46  ;;  %v857_v57 = vadd.f32 1.0, %v601_v48  ;;  %v605_v58 = vmul.f32 2.0, %v349_v49  ;;  %v606_v59 = vmul.f32 2.0, %v350_v50  ;;  %v607_v60 = vmul.f32 2.0, %v351_v55 }
  0xc5   : > { %1111 = vst [vmem:[%s1564_s17 + $0x668] sm:$0xff] %v855_v47  ;;  %v353_v61 = vld [vmem:[%s1543_s30 + $0x6b8] sm:$0xff]  ;;  %v354_v62 = vld [vmem:[%s1543_s30 + $0x6c0] sm:$0xff]  ;;  %1112 = vst [vmem:[%s1564_s17 + $0x670] sm:$0xff] %v856_v51  ;;  %v858_v63 = vadd.f32 1.0, %v602_v52  ;;  %v859_v0 = vadd.f32 1.0, %v603_v53 }
  0xc6   : > { %v860_v1 = vadd.f32 1.0, %v604_v54  ;;  %v608_v2 = vmul.f32 2.0, %v352_v56  ;;  %v355_v3 = vld [vmem:[%s1543_s30 + $0x6c8] sm:$0xff]  ;;  %v356_v4 = vld [vmem:[%s1543_s30 + $0x6d0] sm:$0xff]  ;;  %1113 = vst [vmem:[%s1564_s17 + $0x678] sm:$0xff] %v857_v57  ;;  %v861_v5 = vadd.f32 1.0, %v605_v58 }
  0xc7   : > { %v862_v6 = vadd.f32 1.0, %v606_v59  ;;  %v863_v7 = vadd.f32 1.0, %v607_v60  ;;  %v609_v8 = vmul.f32 2.0, %v353_v61  ;;  %v357_v9 = vld [vmem:[%s1543_s30 + $0x6d8] sm:$0xff]  ;;  %v358_v10 = vld [vmem:[%s1543_s30 + $0x6e0] sm:$0xff]  ;;  %1114 = vst [vmem:[%s1564_s17 + $0x680] sm:$0xff] %v858_v63 }
  0xc8   : > { %1115 = vst [vmem:[%s1564_s17 + $0x688] sm:$0xff] %v859_v0  ;;  %1116 = vst [vmem:[%s1564_s17 + $0x690] sm:$0xff] %v860_v1  ;;  %v864_v11 = vadd.f32 1.0, %v608_v2  ;;  %v610_v12 = vmul.f32 2.0, %v354_v62  ;;  %v611_v13 = vmul.f32 2.0, %v355_v3  ;;  %v612_v14 = vmul.f32 2.0, %v356_v4 }
  0xc9   : > { %v359_v15 = vld [vmem:[%s1543_s30 + $0x6e8] sm:$0xff]  ;;  %v360_v16 = vld [vmem:[%s1543_s30 + $0x6f0] sm:$0xff]  ;;  %1117 = vst [vmem:[%s1564_s17 + $0x698] sm:$0xff] %v861_v5  ;;  %1118 = vst [vmem:[%s1564_s17 + $0x6a0] sm:$0xff] %v862_v6  ;;  %v865_v17 = vadd.f32 1.0, %v609_v8  ;;  %v613_v18 = vmul.f32 2.0, %v357_v9 }
  0xca   : > { %1119 = vst [vmem:[%s1564_s17 + $0x6a8] sm:$0xff] %v863_v7  ;;  %v614_v19 = vmul.f32 2.0, %v358_v10  ;;  %v615_v20 = vmul.f32 2.0, %v359_v15  ;;  %v361_v21 = vld [vmem:[%s1543_s30 + $0x6f8] sm:$0xff]  ;;  %v362_v22 = vld [vmem:[%s1543_s30 + $0x700] sm:$0xff]  ;;  %1120 = vst [vmem:[%s1564_s17 + $0x6b0] sm:$0xff] %v864_v11 }
  0xcb   : > { %v866_v23 = vadd.f32 1.0, %v610_v12  ;;  %v867_v24 = vadd.f32 1.0, %v611_v13  ;;  %v868_v25 = vadd.f32 1.0, %v612_v14  ;;  %v616_v26 = vmul.f32 2.0, %v360_v16  ;;  %v363_v27 = vld [vmem:[%s1543_s30 + $0x708] sm:$0xff]  ;;  %v364_v28 = vld [vmem:[%s1543_s30 + $0x710] sm:$0xff] }
  0xcc   : > { %1121 = vst [vmem:[%s1564_s17 + $0x6b8] sm:$0xff] %v865_v17  ;;  %v869_v29 = vadd.f32 1.0, %v613_v18  ;;  %v870_v30 = vadd.f32 1.0, %v614_v19  ;;  %v871_v31 = vadd.f32 1.0, %v615_v20  ;;  %v617_v32 = vmul.f32 2.0, %v361_v21  ;;  %v365_v33 = vld [vmem:[%s1543_s30 + $0x718] sm:$0xff] }
  0xcd   : > { %v366_v34 = vld [vmem:[%s1543_s30 + $0x720] sm:$0xff]  ;;  %1122 = vst [vmem:[%s1564_s17 + $0x6c0] sm:$0xff] %v866_v23  ;;  %1123 = vst [vmem:[%s1564_s17 + $0x6c8] sm:$0xff] %v867_v24  ;;  %v872_v35 = vadd.f32 1.0, %v616_v26  ;;  %v618_v36 = vmul.f32 2.0, %v362_v22  ;;  %v619_v37 = vmul.f32 2.0, %v363_v27 }
  0xce   : > { %1124 = vst [vmem:[%s1564_s17 + $0x6d0] sm:$0xff] %v868_v25  ;;  %v620_v38 = vmul.f32 2.0, %v364_v28  ;;  %v367_v39 = vld [vmem:[%s1543_s30 + $0x728] sm:$0xff]  ;;  %v368_v40 = vld [vmem:[%s1543_s30 + $0x730] sm:$0xff]  ;;  %1125 = vst [vmem:[%s1564_s17 + $0x6d8] sm:$0xff] %v869_v29  ;;  %v873_v41 = vadd.f32 1.0, %v617_v32 }
  0xcf   : > { %1126 = vst [vmem:[%s1564_s17 + $0x6e0] sm:$0xff] %v870_v30  ;;  %1127 = vst [vmem:[%s1564_s17 + $0x6e8] sm:$0xff] %v871_v31  ;;  %v621_v42 = vmul.f32 2.0, %v365_v33  ;;  %v622_v43 = vmul.f32 2.0, %v366_v34  ;;  %v623_v44 = vmul.f32 2.0, %v367_v39  ;;  %v369_v45 = vld [vmem:[%s1543_s30 + $0x738] sm:$0xff] }
  0xd0   : > { %v370_v46 = vld [vmem:[%s1543_s30 + $0x740] sm:$0xff]  ;;  %1128 = vst [vmem:[%s1564_s17 + $0x6f0] sm:$0xff] %v872_v35  ;;  %v874_v47 = vadd.f32 1.0, %v618_v36  ;;  %v875_v48 = vadd.f32 1.0, %v619_v37  ;;  %v876_v49 = vadd.f32 1.0, %v620_v38  ;;  %v624_v50 = vmul.f32 2.0, %v368_v40 }
  0xd1   : > { %v371_v51 = vld [vmem:[%s1543_s30 + $0x748] sm:$0xff]  ;;  %v372_v52 = vld [vmem:[%s1543_s30 + $0x750] sm:$0xff]  ;;  %1129 = vst [vmem:[%s1564_s17 + $0x6f8] sm:$0xff] %v873_v41  ;;  %v877_v53 = vadd.f32 1.0, %v621_v42  ;;  %v878_v54 = vadd.f32 1.0, %v622_v43  ;;  %v879_v55 = vadd.f32 1.0, %v623_v44 }
  0xd2   : > { %v625_v56 = vmul.f32 2.0, %v369_v45  ;;  %v373_v57 = vld [vmem:[%s1543_s30 + $0x758] sm:$0xff]  ;;  %v374_v58 = vld [vmem:[%s1543_s30 + $0x760] sm:$0xff]  ;;  %1130 = vst [vmem:[%s1564_s17 + $0x700] sm:$0xff] %v874_v47  ;;  %1131 = vst [vmem:[%s1564_s17 + $0x708] sm:$0xff] %v875_v48  ;;  %v880_v59 = vadd.f32 1.0, %v624_v50 }
  0xd3   : > { %1132 = vst [vmem:[%s1564_s17 + $0x710] sm:$0xff] %v876_v49  ;;  %v626_v60 = vmul.f32 2.0, %v370_v46  ;;  %v627_v61 = vmul.f32 2.0, %v371_v51  ;;  %v628_v62 = vmul.f32 2.0, %v372_v52  ;;  %v375_v63 = vld [vmem:[%s1543_s30 + $0x768] sm:$0xff]  ;;  %v376_v0 = vld [vmem:[%s1543_s30 + $0x770] sm:$0xff] }
  0xd4   : > { %1133 = vst [vmem:[%s1564_s17 + $0x718] sm:$0xff] %v877_v53  ;;  %1134 = vst [vmem:[%s1564_s17 + $0x720] sm:$0xff] %v878_v54  ;;  %v881_v1 = vadd.f32 1.0, %v625_v56  ;;  %v629_v2 = vmul.f32 2.0, %v373_v57  ;;  %v630_v3 = vmul.f32 2.0, %v374_v58  ;;  %v631_v4 = vmul.f32 2.0, %v375_v63 }
  0xd5   : > { %1135 = vst [vmem:[%s1564_s17 + $0x728] sm:$0xff] %v879_v55  ;;  %v377_v5 = vld [vmem:[%s1543_s30 + $0x778] sm:$0xff]  ;;  %v378_v6 = vld [vmem:[%s1543_s30 + $0x780] sm:$0xff]  ;;  %1136 = vst [vmem:[%s1564_s17 + $0x730] sm:$0xff] %v880_v59  ;;  %v882_v7 = vadd.f32 1.0, %v626_v60  ;;  %v883_v8 = vadd.f32 1.0, %v627_v61 }
  0xd6   : > { %v884_v9 = vadd.f32 1.0, %v628_v62  ;;  %v632_v10 = vmul.f32 2.0, %v376_v0  ;;  %v379_v11 = vld [vmem:[%s1543_s30 + $0x788] sm:$0xff]  ;;  %v380_v12 = vld [vmem:[%s1543_s30 + $0x790] sm:$0xff]  ;;  %1137 = vst [vmem:[%s1564_s17 + $0x738] sm:$0xff] %v881_v1  ;;  %v885_v13 = vadd.f32 1.0, %v629_v2 }
  0xd7   : > { %v886_v14 = vadd.f32 1.0, %v630_v3  ;;  %v887_v15 = vadd.f32 1.0, %v631_v4  ;;  %v633_v16 = vmul.f32 2.0, %v377_v5  ;;  %v381_v17 = vld [vmem:[%s1543_s30 + $0x798] sm:$0xff]  ;;  %v382_v18 = vld [vmem:[%s1543_s30 + $0x7a0] sm:$0xff]  ;;  %1138 = vst [vmem:[%s1564_s17 + $0x740] sm:$0xff] %v882_v7 }
  0xd8   : > { %1139 = vst [vmem:[%s1564_s17 + $0x748] sm:$0xff] %v883_v8  ;;  %1140 = vst [vmem:[%s1564_s17 + $0x750] sm:$0xff] %v884_v9  ;;  %v888_v19 = vadd.f32 1.0, %v632_v10  ;;  %v634_v20 = vmul.f32 2.0, %v378_v6  ;;  %v635_v21 = vmul.f32 2.0, %v379_v11  ;;  %v636_v22 = vmul.f32 2.0, %v380_v12 }
  0xd9   : > { %v383_v23 = vld [vmem:[%s1543_s30 + $0x7a8] sm:$0xff]  ;;  %v384_v24 = vld [vmem:[%s1543_s30 + $0x7b0] sm:$0xff]  ;;  %1141 = vst [vmem:[%s1564_s17 + $0x758] sm:$0xff] %v885_v13  ;;  %1142 = vst [vmem:[%s1564_s17 + $0x760] sm:$0xff] %v886_v14  ;;  %v889_v25 = vadd.f32 1.0, %v633_v16  ;;  %v637_v26 = vmul.f32 2.0, %v381_v17 }
  0xda   : > { %1143 = vst [vmem:[%s1564_s17 + $0x768] sm:$0xff] %v887_v15  ;;  %v638_v27 = vmul.f32 2.0, %v382_v18  ;;  %v639_v28 = vmul.f32 2.0, %v383_v23  ;;  %v385_v29 = vld [vmem:[%s1543_s30 + $0x7b8] sm:$0xff]  ;;  %v386_v30 = vld [vmem:[%s1543_s30 + $0x7c0] sm:$0xff]  ;;  %1144 = vst [vmem:[%s1564_s17 + $0x770] sm:$0xff] %v888_v19 }
  0xdb   : > { %v890_v31 = vadd.f32 1.0, %v634_v20  ;;  %v891_v32 = vadd.f32 1.0, %v635_v21  ;;  %v892_v33 = vadd.f32 1.0, %v636_v22  ;;  %v640_v34 = vmul.f32 2.0, %v384_v24  ;;  %v387_v35 = vld [vmem:[%s1543_s30 + $0x7c8] sm:$0xff]  ;;  %v388_v36 = vld [vmem:[%s1543_s30 + $0x7d0] sm:$0xff] }
  0xdc   : > { %1145 = vst [vmem:[%s1564_s17 + $0x778] sm:$0xff] %v889_v25  ;;  %v893_v37 = vadd.f32 1.0, %v637_v26  ;;  %v894_v38 = vadd.f32 1.0, %v638_v27  ;;  %v895_v39 = vadd.f32 1.0, %v639_v28  ;;  %v641_v40 = vmul.f32 2.0, %v385_v29  ;;  %v389_v41 = vld [vmem:[%s1543_s30 + $0x7d8] sm:$0xff] }
  0xdd   : > { %v390_v42 = vld [vmem:[%s1543_s30 + $0x7e0] sm:$0xff]  ;;  %1146 = vst [vmem:[%s1564_s17 + $0x780] sm:$0xff] %v890_v31  ;;  %1147 = vst [vmem:[%s1564_s17 + $0x788] sm:$0xff] %v891_v32  ;;  %v896_v43 = vadd.f32 1.0, %v640_v34  ;;  %v642_v44 = vmul.f32 2.0, %v386_v30  ;;  %v643_v45 = vmul.f32 2.0, %v387_v35 }
  0xde   : > { %1148 = vst [vmem:[%s1564_s17 + $0x790] sm:$0xff] %v892_v33  ;;  %v644_v46 = vmul.f32 2.0, %v388_v36  ;;  %v391_v47 = vld [vmem:[%s1543_s30 + $0x7e8] sm:$0xff]  ;;  %v392_v48 = vld [vmem:[%s1543_s30 + $0x7f0] sm:$0xff]  ;;  %1149 = vst [vmem:[%s1564_s17 + $0x798] sm:$0xff] %v893_v37  ;;  %v897_v49 = vadd.f32 1.0, %v641_v40 }
  0xdf   : > { %1150 = vst [vmem:[%s1564_s17 + $0x7a0] sm:$0xff] %v894_v38  ;;  %1151 = vst [vmem:[%s1564_s17 + $0x7a8] sm:$0xff] %v895_v39  ;;  %v645_v50 = vmul.f32 2.0, %v389_v41  ;;  %v646_v51 = vmul.f32 2.0, %v390_v42  ;;  %v647_v52 = vmul.f32 2.0, %v391_v47  ;;  %v393_v53 = vld [vmem:[%s1543_s30 + $0x7f8] sm:$0xff] }
  0xe0   : > { %1152 = vst [vmem:[%s1564_s17 + $0x7b0] sm:$0xff] %v896_v43  ;;  %v898_v54 = vadd.f32 1.0, %v642_v44  ;;  %v899_v55 = vadd.f32 1.0, %v643_v45  ;;  %v900_v56 = vadd.f32 1.0, %v644_v46  ;;  %v648_v57 = vmul.f32 2.0, %v392_v48  ;;  %1153 = vst [vmem:[%s1564_s17 + $0x7b8] sm:$0xff] %v897_v49 }
  0xe1   : > { %v901_v58 = vadd.f32 1.0, %v645_v50  ;;  %v902_v59 = vadd.f32 1.0, %v646_v51  ;;  %v903_v60 = vadd.f32 1.0, %v647_v52  ;;  %v649_v61 = vmul.f32 2.0, %v393_v53  ;;  %s1163_s10 = scalar_lea.sflag [#allocation4], %s1537_s23  ;;  %s1350_s3 = scalar_lea.vmem %s2067_s27, 32768 }
  0xe2   : > { %1154 = vst [vmem:[%s1564_s17 + $0x7c0] sm:$0xff] %v898_v54  ;;  %1155 = vst [vmem:[%s1564_s17 + $0x7c8] sm:$0xff] %v899_v55  ;;  %v904_v62 = vadd.f32 1.0, %v648_v57  ;;  %p1351_p6 = scmp.ne.s32.totalorder %s2067_s27, %s1350_s3  ;;  %p2123_p10 = scmp.ne.s32.totalorder %s2120_s18, 0 }
  0xe3   : > { %1156 = vst [vmem:[%s1564_s17 + $0x7d0] sm:$0xff] %v900_v56  ;;  %1157 = vst [vmem:[%s1564_s17 + $0x7d8] sm:$0xff] %v901_v58  ;;  %v905_v63 = vadd.f32 1.0, %v649_v61  ;;  %s1421_s4 = smov [#allocation5]  }
  0xe4   : > { %1158 = vst [vmem:[%s1564_s17 + $0x7e0] sm:$0xff] %v902_v59  ;;  %1159 = vst [vmem:[%s1564_s17 + $0x7e8] sm:$0xff] %v903_v60  ;;  %p1352_p11 = pnand %p1351_p6, %p2123_p10  ;;  %s1354_s5 = sshll.u32 %s1421_s4, 4  ;;  %s1355_s5 = int_to_ptr.vmem [resolvable:$false] %s1354_s5 }
  0xe5   : > { %1160 = vst [vmem:[%s1564_s17 + $0x7f0] sm:$0xff] %v904_v62  ;;  %1161 = vst [vmem:[%s1564_s17 + $0x7f8] sm:$0xff] %v905_v63  ;;  %s1356_s11 = scalar_lea.vmem %s1355_s5, 65536  ;;  %p1357_p8 = scmp.lt.s32.totalorder %s2067_s27, %s1355_s5 }
  0xe6   : > { %p1353_p12 = pneg %p1352_p11  ;;  %p1358_p9 = scmp.lt.s32.totalorder %s1356_s11, %s1350_s3 }
  0xe8   : > { %p1359_p13 = por %p1358_p9, %p1357_p8 }
  0xea   : > { %p1360_p1 = pnand %p1359_p13, %p1353_p12 }
  0xec   : > { %1363 = shalt.err (!%p1360_p1)
}
  0xed   : > { %s1364_s13 = scalar_lea.hbm %s2065_s2, 32768  ;;  %s1368_s20 = scalar_lea.hbm %s2116_s1, 131072 }
  0xee   : > { %p1365_p3 = scmp.ne.s32.totalorder %s2065_s2, %s1364_s13  ;;  %p1369_p0 = scmp.lt.u32.totalorder %s2065_s2, %s2116_s1 }
  0xef   : > { %p1370_p2 = scmp.lt.u32.totalorder %s1368_s20, %s1364_s13  ;;  %p1372_p6 = scmp.lt.u32.totalorder %s1364_s13, %s2065_s2 }
  0xf0   : > { %p1366_p4 = pnand %p1365_p3, %p2123_p10 }
  0xf1   : > { %p1371_p7 = por %p1370_p2, %p1369_p0 }
  0xf2   : > { %p1367_p5 = pneg %p1366_p4 }
  0xf3   : > { %p1373_p11 = por %p1372_p6, %p1371_p7 }
  0xf5   : > { %p1374_p12 = pnand %p1373_p11, %p1367_p5 }
  0xf7   : > { %1377 = shalt.err (!%p1374_p12)
}
  0xf8   : > { %s1422_s24 = smov 512   ;;  %s1423_s26 = smov 32  }
  0xf9   : > { %1272 = dma.vmem_to_hbm [thread:$0]  (%p2123_p10), %s2067_s27, 32768, %s2065_s2, %s1163_s10, %s1422_s24, %s1422_s24, %s1423_s26  }
  0xfa PF: > { %p1283_p8 = scmp.ge.s32.totalorder %s1416_s9, 2  ;;  %s1192_s30 = sand.u32 1, %s1404_s6  }
  0xfb   : > { %p2124_p9 = scmp.ne.s32.totalorder %s2121_s19, 0  ;;  %s1193_s17 = scalar_lea.sflag [#allocation4], %s1192_s30 }
  0xfd   : > { %p1279_p13 = pnand %p1283_p8, %p2124_p9 }
  0xff   : > { %1399 = dma.done.wait (!%p1279_p13), %s1193_s17, 32768  }
 0x100   : > { %1401 = vsyncadd (!%p1279_p13), %s1193_s17, 4294934528  ;;  %p14_p1 = scmp.ge.s32.totalorder %s1459_s12, 6   ;;  %s2125_s6 = smov %s1408_s7 }
 0x101   : > { %s2126_s7 = smov %s1412_s8  ;;  %s2127_s8 = smov %s1471_s15 }
 0x102   : > { %s2128_s9 = smov %s1459_s12  ;;  %16 = sbr.rel (!%p14_p1) target bundleno = 5 (0x5), region = 69 }
 0x109   :  { %1198 = vsyncpa [#allocation3], 1 }
 0x10a   :  { %1200 = vsyncpa [#allocation3 + $0x1], 1 }
 0x10b   :  { %1201 = vsyncpa [#allocation4], 1 }
 0x10c   :  { %1203 = vsyncpa [#allocation4 + $0x1], 1 }

</bundles_post_ra>
